<compile_context>
chip_gen: v7x
topology: tpu7x:2x2x1
jax: 0.10.0
libtpu: 0.0.40
codegen_flags: <defaults>
</compile_context>

<pallas_src>
import math

import jax
import jax.numpy as jnp
from jax.experimental import pallas as pl
from jax.experimental.pallas import tpu as pltpu


# ----------------------------- model dims -----------------------------------
B = 2          # batch
S = 8          # sequence length
H = 32         # hidden_dim
NH = 4         # num_heads
HD = H // NH   # head_dim
FF = 64        # feed_forward_dim
EPS = 1e-5     # nn.LayerNorm default eps
BS = B * S     # batch folded into sublanes

# Row layout of the fused parameter slab (one (P_ROWS, 128) f32 VMEM block):
#   rows [0,   H)        cols [0, 3H) : Wqkv  (1/sqrt(HD) folded into Q cols)
#   rows [H,  2H)        cols [0,  H) : Wo
#   rows [2H, 3H)        cols [0, FF) : W1
#   rows [3H, 3H+FF)     cols [0,  H) : W2
#   row  3H+FF           cols [0, 3H) : bqkv  (scale folded into bq)
#   row  3H+FF+1         cols [0, FF) : b1
#   rows [3H+FF+2, +8)   cols [0,  H) : bo, ln1_g, ln1_b, b2, ln2_g, ln2_b
_R_VEC = 3 * H + FF          # 160
P_ROWS = _R_VEC + 8          # 168 (multiple of 8)


def _layer_norm(x, gamma, beta):
    # x: (N, D); gamma/beta: (1, D)
    mu = jnp.mean(x, axis=-1, keepdims=True)
    var = jnp.mean((x - mu) ** 2, axis=-1, keepdims=True)
    inv = jax.lax.rsqrt(var + EPS)
    return (x - mu) * inv * gamma + beta


def transformer_block_kernel(
    x_ref,      # (B, S, H)
    p_ref,      # (P_ROWS, 128) fused parameter slab
    out_ref,    # (B, S, H)
    attn_ref,   # (B, NH, S, S)
):
    # ---- static-slice views into the fused parameter slab (free) ----
    wqkv = p_ref[0:H, 0:3 * H]               # (H, 3H)
    wo   = p_ref[H:2 * H, 0:H]               # (H, H)
    w1   = p_ref[2 * H:3 * H, 0:FF]          # (H, FF)
    w2   = p_ref[3 * H:3 * H + FF, 0:H]      # (FF, H)
    bqkv = p_ref[_R_VEC:_R_VEC + 1, 0:3 * H]         # (1, 3H)
    b1   = p_ref[_R_VEC + 1:_R_VEC + 2, 0:FF]        # (1, FF)
    bo   = p_ref[_R_VEC + 2:_R_VEC + 3, 0:H]
    ln1g = p_ref[_R_VEC + 3:_R_VEC + 4, 0:H]
    ln1b = p_ref[_R_VEC + 4:_R_VEC + 5, 0:H]
    b2   = p_ref[_R_VEC + 5:_R_VEC + 6, 0:H]
    ln2g = p_ref[_R_VEC + 6:_R_VEC + 7, 0:H]
    ln2b = p_ref[_R_VEC + 7:_R_VEC + 8, 0:H]

    # ---- fold batch into sublanes: (B*S, H) ----
    x_all = jnp.concatenate([x_ref[b] for b in range(B)], axis=0)     # (BS, H)

    # ---- fused QKV projection (one MXU push, scale pre-folded into Q) ----
    qkv = (jnp.dot(x_all, wqkv, preferred_element_type=jnp.float32)
           + bqkv)                                                    # (BS, 3H)

    # Single XLU transpose of K for ALL batches/heads.
    kT = qkv[:, H:2 * H].T                                            # (H, BS)

    # ---- per-(batch, head) scaled dot-product attention ----
    # TODO(synk): optional attention mask (mask=None path implemented only)
    o_rows = []
    for b in range(B):
        rlo = b * S
        head_outs = []
        for h in range(NH):
            lo = h * HD
            qh  = qkv[rlo:rlo + S, lo:lo + HD]                        # (S, HD)
            kTh = kT[lo:lo + HD, rlo:rlo + S]                         # (HD, S)
            vh  = qkv[rlo:rlo + S, 2 * H + lo:2 * H + lo + HD]        # (S, HD)

            s = jnp.dot(qh, kTh, preferred_element_type=jnp.float32)  # (S, S)
            s = s - jnp.max(s, axis=-1, keepdims=True)
            e = jnp.exp(s)
            p = e / jnp.sum(e, axis=-1, keepdims=True)                # exact softmax

            # direct head-major store: matches torch attn_weights layout
            attn_ref[b, h, :, :] = p.astype(attn_ref.dtype)

            head_outs.append(jnp.dot(p, vh, preferred_element_type=jnp.float32))
        o_rows.append(jnp.concatenate(head_outs, axis=-1))            # (S, H)
    attn_out = jnp.concatenate(o_rows, axis=0)                        # (BS, H)

    # ---- output projection ----
    attn_out = (jnp.dot(attn_out, wo, preferred_element_type=jnp.float32) + bo)

    # ---- residual + LayerNorm 1 ----
    x1 = _layer_norm(x_all + attn_out, ln1g, ln1b)

    # ---- feed-forward (Linear -> ReLU -> Linear) ----
    h1 = jnp.dot(x1, w1, preferred_element_type=jnp.float32) + b1
    h1 = jnp.maximum(h1, 0.0)
    ffo = jnp.dot(h1, w2, preferred_element_type=jnp.float32) + b2

    # ---- residual + LayerNorm 2 ----
    x2 = _layer_norm(x1 + ffo, ln2g, ln2b)

    # ---- natural block-shaped output stores ----
    for b in range(B):
        out_ref[b] = x2[b * S:(b + 1) * S, :].astype(out_ref.dtype)


def fuse_params(params):
    """ONE-TIME parameter preprocessing (do at init, not per forward call).

    Folds the attention scale into the Q projection and packs all weights,
    biases and LayerNorm vectors into a single (P_ROWS, 128) f32 slab.
    """
    scale = 1.0 / math.sqrt(HD)
    wqkv = jnp.concatenate(
        [params["wq"] * scale, params["wk"], params["wv"]], axis=1)   # (H, 3H)
    bqkv = jnp.concatenate(
        [params["bq"] * scale, params["bk"], params["bv"]], axis=1)   # (1, 3H)
    vecs = jnp.concatenate(
        [params["bo"], params["ln1_g"], params["ln1_b"],
         params["b2"], params["ln2_g"], params["ln2_b"]], axis=0)     # (6, H)

    slab = jnp.zeros((P_ROWS, 128), jnp.float32)
    slab = slab.at[0:H, 0:3 * H].set(wqkv)
    slab = slab.at[H:2 * H, 0:H].set(params["wo"])
    slab = slab.at[2 * H:3 * H, 0:FF].set(params["w1"])
    slab = slab.at[3 * H:3 * H + FF, 0:H].set(params["w2"])
    slab = slab.at[_R_VEC:_R_VEC + 1, 0:3 * H].set(bqkv)
    slab = slab.at[_R_VEC + 1:_R_VEC + 2, 0:FF].set(params["b1"])
    slab = slab.at[_R_VEC + 2:_R_VEC + 8, 0:H].set(vecs)
    return slab


@jax.jit
def transformer_block(x, param_slab):
    """x: (B, S, H) f32.  param_slab: (P_ROWS, 128) f32 from fuse_params()."""
    out, attn = pl.pallas_call(
        transformer_block_kernel,
        out_shape=(
            jax.ShapeDtypeStruct((B, S, H), jnp.float32),
            jax.ShapeDtypeStruct((B, NH, S, S), jnp.float32),
        ),
        grid=(1,),  # single step: batch folded into sublanes inside the kernel
        in_specs=[
            pl.BlockSpec((B, S, H), lambda i: (0, 0, 0)),
            pl.BlockSpec((P_ROWS, 128), lambda i: (0, 0)),
        ],
        out_specs=(
            pl.BlockSpec((B, S, H), lambda i: (0, 0, 0)),
            pl.BlockSpec((B, NH, S, S), lambda i: (0, 0, 0, 0)),
        ),
        compiler_params=pltpu.CompilerParams(
            dimension_semantics=("arbitrary",)),
    )(x, param_slab)
    return out, attn


# -------------------------- pure-JAX reference -------------------------------
def reference(x, p):
    def ln(z, g, b):
        mu = jnp.mean(z, axis=-1, keepdims=True)
        var = jnp.mean((z - mu) ** 2, axis=-1, keepdims=True)
        return (z - mu) / jnp.sqrt(var + EPS) * g + b

    q = x @ p["wq"] + p["bq"]
    k = x @ p["wk"] + p["bk"]
    v = x @ p["wv"] + p["bv"]
    qh = q.reshape(B, S, NH, HD).transpose(0, 2, 1, 3)
    kh = k.reshape(B, S, NH, HD).transpose(0, 2, 1, 3)
    vh = v.reshape(B, S, NH, HD).transpose(0, 2, 1, 3)
    scores = jnp.einsum("bhqd,bhkd->bhqk", qh, kh) / math.sqrt(HD)
    attn = jax.nn.softmax(scores, axis=-1)
    o = jnp.einsum("bhqk,bhkd->bhqd", attn, vh)
    o = o.transpose(0, 2, 1, 3).reshape(B, S, H)
    o = o @ p["wo"] + p["bo"]
    x1 = ln(x + o, p["ln1_g"], p["ln1_b"])
    ff = jnp.maximum(x1 @ p["w1"] + p["b1"], 0.0) @ p["w2"] + p["b2"]
    x2 = ln(x1 + ff, p["ln2_g"], p["ln2_b"])
    return x2, attn


# ------------------------------- main ----------------------------------------
if __name__ == "__main__":
    key = jax.random.PRNGKey(0)
    ks = jax.random.split(key, 17)

    def init(k, shape, scale=0.1):
        return (scale * jax.random.normal(k, shape)).astype(jnp.float32)

    params = {
        "wq": init(ks[0], (H, H)),  "bq": init(ks[1], (1, H)),
        "wk": init(ks[2], (H, H)),  "bk": init(ks[3], (1, H)),
        "wv": init(ks[4], (H, H)),  "bv": init(ks[5], (1, H)),
        "wo": init(ks[6], (H, H)),  "bo": init(ks[7], (1, H)),
        "ln1_g": jnp.ones((1, H), jnp.float32) + init(ks[8], (1, H), 0.01),
        "ln1_b": init(ks[9], (1, H), 0.01),
        "w1": init(ks[10], (H, FF)), "b1": init(ks[11], (1, FF)),
        "w2": init(ks[12], (FF, H)), "b2": init(ks[13], (1, H)),
        "ln2_g": jnp.ones((1, H), jnp.float32) + init(ks[14], (1, H), 0.01),
        "ln2_b": init(ks[15], (1, H), 0.01),
    }

    x = jax.random.normal(ks[16], (B, S, H), dtype=jnp.float32)

    # One-time parameter preprocessing (kept out of the per-call path).
    param_slab = jax.block_until_ready(fuse_params(params))

    out, attn_w = transformer_block(x, param_slab)
    out = jax.block_until_ready(out)
    attn_w = jax.block_until_ready(attn_w)

    ref_out, ref_attn = reference(x, params)
    assert out.shape == (B, S, H) and attn_w.shape == (B, NH, S, S)
    # Softmax is exact now; residual tolerance covers MXU-vs-XLA matmul
    # rounding differences only.
    assert jnp.allclose(out, ref_out, atol=2e-3, rtol=2e-3), "output mismatch"
    assert jnp.allclose(attn_w, ref_attn, atol=2e-3, rtol=2e-3), "attn mismatch"

    print("KERNEL_OK")
</pallas_src>

<mosaic_0001>
module attributes {stable_mosaic.version = 11 : i64} {
  func.func @transformer_block_kernel(%arg0: i32, %arg1: memref<2x8x32xf32, #tpu.memory_space<vmem>>, %arg2: memref<168x128xf32, #tpu.memory_space<vmem>>, %arg3: memref<2x8x32xf32, #tpu.memory_space<vmem>>, %arg4: memref<2x4x8x8xf32, #tpu.memory_space<vmem>>) attributes {dimension_semantics = [#tpu.dimension_semantics<arbitrary>], iteration_bounds = array<i64: 1>, scalar_prefetch = 0 : i64, scratch_operands = 0 : i64, tpu.core_type = #tpu.core_type<tc>, window_params = [{pipeline_mode = #tpu.pipeline_mode<synchronous>, transform_indices = @transform_0, window_bounds = array<i64: 2, 8, 32>}, {pipeline_mode = #tpu.pipeline_mode<synchronous>, transform_indices = @transform_1, window_bounds = array<i64: 168, 128>}, {pipeline_mode = #tpu.pipeline_mode<synchronous>, transform_indices = @transform_2, window_bounds = array<i64: 2, 8, 32>}, {pipeline_mode = #tpu.pipeline_mode<synchronous>, transform_indices = @transform_3, window_bounds = array<i64: 2, 4, 8, 8>}]} {
    %c0 = arith.constant 0 : index
    %c0_0 = arith.constant 0 : index
    %0 = vector.load %arg2[%c0, %c0_0] : memref<168x128xf32, #tpu.memory_space<vmem>>, vector<32x96xf32>
    %c32 = arith.constant 32 : index
    %c0_1 = arith.constant 0 : index
    %1 = vector.load %arg2[%c32, %c0_1] : memref<168x128xf32, #tpu.memory_space<vmem>>, vector<32x32xf32>
    %c64 = arith.constant 64 : index
    %c0_2 = arith.constant 0 : index
    %2 = vector.load %arg2[%c64, %c0_2] : memref<168x128xf32, #tpu.memory_space<vmem>>, vector<32x64xf32>
    %c96 = arith.constant 96 : index
    %c0_3 = arith.constant 0 : index
    %3 = vector.load %arg2[%c96, %c0_3] : memref<168x128xf32, #tpu.memory_space<vmem>>, vector<64x32xf32>
    %c160 = arith.constant 160 : index
    %c0_4 = arith.constant 0 : index
    %4 = vector.load %arg2[%c160, %c0_4] : memref<168x128xf32, #tpu.memory_space<vmem>>, vector<1x96xf32>
    %c161 = arith.constant 161 : index
    %c0_5 = arith.constant 0 : index
    %5 = vector.load %arg2[%c161, %c0_5] : memref<168x128xf32, #tpu.memory_space<vmem>>, vector<1x64xf32>
    %c162 = arith.constant 162 : index
    %c0_6 = arith.constant 0 : index
    %6 = vector.load %arg2[%c162, %c0_6] : memref<168x128xf32, #tpu.memory_space<vmem>>, vector<1x32xf32>
    %c163 = arith.constant 163 : index
    %c0_7 = arith.constant 0 : index
    %7 = vector.load %arg2[%c163, %c0_7] : memref<168x128xf32, #tpu.memory_space<vmem>>, vector<1x32xf32>
    %c164 = arith.constant 164 : index
    %c0_8 = arith.constant 0 : index
    %8 = vector.load %arg2[%c164, %c0_8] : memref<168x128xf32, #tpu.memory_space<vmem>>, vector<1x32xf32>
    %c165 = arith.constant 165 : index
    %c0_9 = arith.constant 0 : index
    %9 = vector.load %arg2[%c165, %c0_9] : memref<168x128xf32, #tpu.memory_space<vmem>>, vector<1x32xf32>
    %c166 = arith.constant 166 : index
    %c0_10 = arith.constant 0 : index
    %10 = vector.load %arg2[%c166, %c0_10] : memref<168x128xf32, #tpu.memory_space<vmem>>, vector<1x32xf32>
    %c167 = arith.constant 167 : index
    %c0_11 = arith.constant 0 : index
    %11 = vector.load %arg2[%c167, %c0_11] : memref<168x128xf32, #tpu.memory_space<vmem>>, vector<1x32xf32>
    %c0_12 = arith.constant 0 : index
    %c0_13 = arith.constant 0 : index
    %c0_14 = arith.constant 0 : index
    %12 = vector.load %arg1[%c0_12, %c0_13, %c0_14] : memref<2x8x32xf32, #tpu.memory_space<vmem>>, vector<1x8x32xf32>
    %13 = vector.shape_cast %12 : vector<1x8x32xf32> to vector<8x32xf32>
    %c1 = arith.constant 1 : index
    %c0_15 = arith.constant 0 : index
    %c0_16 = arith.constant 0 : index
    %14 = vector.load %arg1[%c1, %c0_15, %c0_16] : memref<2x8x32xf32, #tpu.memory_space<vmem>>, vector<1x8x32xf32>
    %15 = vector.shape_cast %14 : vector<1x8x32xf32> to vector<8x32xf32>
    %16 = tpu.concatenate %13, %15 in 0 : vector<8x32xf32>, vector<8x32xf32> -> vector<16x32xf32>
    %cst = arith.constant dense<0.000000e+00> : vector<16x96xf32>
    %17 = tpu.matmul %16, %0, %cst {dimension_numbers = #tpu.dot_dimension_numbers<[1], [0], [0], [1], [0, 0, 1, 1], [], []>} : vector<16x32xf32>, vector<32x96xf32>, vector<16x96xf32> -> vector<16x96xf32>
    %18 = vector.broadcast %4 : vector<1x96xf32> to vector<16x96xf32>
    %19 = arith.addf %17, %18 : vector<16x96xf32>
    %20 = vector.extract_strided_slice %19 {offsets = [0, 32], sizes = [16, 32], strides = [1, 1]} : vector<16x96xf32> to vector<16x32xf32>
    %21 = tpu.transpose %20, [1, 0] : vector<16x32xf32> -> vector<32x16xf32>
    %22 = vector.extract_strided_slice %19 {offsets = [0, 0], sizes = [8, 8], strides = [1, 1]} : vector<16x96xf32> to vector<8x8xf32>
    %23 = vector.extract_strided_slice %21 {offsets = [0, 0], sizes = [8, 8], strides = [1, 1]} : vector<32x16xf32> to vector<8x8xf32>
    %24 = vector.extract_strided_slice %19 {offsets = [0, 64], sizes = [8, 8], strides = [1, 1]} : vector<16x96xf32> to vector<8x8xf32>
    %cst_17 = arith.constant dense<0.000000e+00> : vector<8x8xf32>
    %25 = tpu.matmul %22, %23, %cst_17 {dimension_numbers = #tpu.dot_dimension_numbers<[1], [0], [0], [1], [0, 0, 1, 1], [], []>} : vector<8x8xf32>, vector<8x8xf32>, vector<8x8xf32> -> vector<8x8xf32>
    %cst_18 = arith.constant dense<0xFF800000> : vector<8xf32>
    %26 = vector.multi_reduction <maximumf>, %25, %cst_18 [1] : vector<8x8xf32> to vector<8xf32>
    %27 = vector.shape_cast %26 : vector<8xf32> to vector<8x1xf32>
    %28 = vector.broadcast %27 : vector<8x1xf32> to vector<8x8xf32>
    %29 = arith.subf %25, %28 : vector<8x8xf32>
    %30 = math.exp %29 : vector<8x8xf32>
    %cst_19 = arith.constant dense<0.000000e+00> : vector<8xf32>
    %31 = vector.multi_reduction <add>, %30, %cst_19 [1] : vector<8x8xf32> to vector<8xf32>
    %32 = vector.shape_cast %31 : vector<8xf32> to vector<8x1xf32>
    %33 = vector.broadcast %32 : vector<8x1xf32> to vector<8x8xf32>
    %34 = arith.divf %30, %33 : vector<8x8xf32>
    %c0_20 = arith.constant 0 : index
    %c0_21 = arith.constant 0 : index
    %c0_22 = arith.constant 0 : index
    %c0_23 = arith.constant 0 : index
    %35 = vector.load %arg4[%c0_20, %c0_21, %c0_22, %c0_23] : memref<2x4x8x8xf32, #tpu.memory_space<vmem>>, vector<1x1x8x8xf32>
    %36 = vector.shape_cast %35 : vector<1x1x8x8xf32> to vector<8x8xf32>
    %37 = vector.shape_cast %34 : vector<8x8xf32> to vector<1x1x8x8xf32>
    tpu.vector_store %arg4[%c0_20, %c0_21, %c0_22, %c0_23], %37 {strides = array<i32>} : memref<2x4x8x8xf32, #tpu.memory_space<vmem>>, vector<1x1x8x8xf32>,
    %cst_24 = arith.constant dense<0.000000e+00> : vector<8x8xf32>
    %38 = tpu.matmul %34, %24, %cst_24 {dimension_numbers = #tpu.dot_dimension_numbers<[1], [0], [0], [1], [0, 0, 1, 1], [], []>} : vector<8x8xf32>, vector<8x8xf32>, vector<8x8xf32> -> vector<8x8xf32>
    %39 = vector.extract_strided_slice %19 {offsets = [0, 8], sizes = [8, 8], strides = [1, 1]} : vector<16x96xf32> to vector<8x8xf32>
    %40 = vector.extract_strided_slice %21 {offsets = [8, 0], sizes = [8, 8], strides = [1, 1]} : vector<32x16xf32> to vector<8x8xf32>
    %41 = vector.extract_strided_slice %19 {offsets = [0, 72], sizes = [8, 8], strides = [1, 1]} : vector<16x96xf32> to vector<8x8xf32>
    %cst_25 = arith.constant dense<0.000000e+00> : vector<8x8xf32>
    %42 = tpu.matmul %39, %40, %cst_25 {dimension_numbers = #tpu.dot_dimension_numbers<[1], [0], [0], [1], [0, 0, 1, 1], [], []>} : vector<8x8xf32>, vector<8x8xf32>, vector<8x8xf32> -> vector<8x8xf32>
    %cst_26 = arith.constant dense<0xFF800000> : vector<8xf32>
    %43 = vector.multi_reduction <maximumf>, %42, %cst_26 [1] : vector<8x8xf32> to vector<8xf32>
    %44 = vector.shape_cast %43 : vector<8xf32> to vector<8x1xf32>
    %45 = vector.broadcast %44 : vector<8x1xf32> to vector<8x8xf32>
    %46 = arith.subf %42, %45 : vector<8x8xf32>
    %47 = math.exp %46 : vector<8x8xf32>
    %cst_27 = arith.constant dense<0.000000e+00> : vector<8xf32>
    %48 = vector.multi_reduction <add>, %47, %cst_27 [1] : vector<8x8xf32> to vector<8xf32>
    %49 = vector.shape_cast %48 : vector<8xf32> to vector<8x1xf32>
    %50 = vector.broadcast %49 : vector<8x1xf32> to vector<8x8xf32>
    %51 = arith.divf %47, %50 : vector<8x8xf32>
    %c0_28 = arith.constant 0 : index
    %c1_29 = arith.constant 1 : index
    %c0_30 = arith.constant 0 : index
    %c0_31 = arith.constant 0 : index
    %52 = vector.load %arg4[%c0_28, %c1_29, %c0_30, %c0_31] : memref<2x4x8x8xf32, #tpu.memory_space<vmem>>, vector<1x1x8x8xf32>
    %53 = vector.shape_cast %52 : vector<1x1x8x8xf32> to vector<8x8xf32>
    %54 = vector.shape_cast %51 : vector<8x8xf32> to vector<1x1x8x8xf32>
    tpu.vector_store %arg4[%c0_28, %c1_29, %c0_30, %c0_31], %54 {strides = array<i32>} : memref<2x4x8x8xf32, #tpu.memory_space<vmem>>, vector<1x1x8x8xf32>,
    %cst_32 = arith.constant dense<0.000000e+00> : vector<8x8xf32>
    %55 = tpu.matmul %51, %41, %cst_32 {dimension_numbers = #tpu.dot_dimension_numbers<[1], [0], [0], [1], [0, 0, 1, 1], [], []>} : vector<8x8xf32>, vector<8x8xf32>, vector<8x8xf32> -> vector<8x8xf32>
    %56 = vector.extract_strided_slice %19 {offsets = [0, 16], sizes = [8, 8], strides = [1, 1]} : vector<16x96xf32> to vector<8x8xf32>
    %57 = vector.extract_strided_slice %21 {offsets = [16, 0], sizes = [8, 8], strides = [1, 1]} : vector<32x16xf32> to vector<8x8xf32>
    %58 = vector.extract_strided_slice %19 {offsets = [0, 80], sizes = [8, 8], strides = [1, 1]} : vector<16x96xf32> to vector<8x8xf32>
    %cst_33 = arith.constant dense<0.000000e+00> : vector<8x8xf32>
    %59 = tpu.matmul %56, %57, %cst_33 {dimension_numbers = #tpu.dot_dimension_numbers<[1], [0], [0], [1], [0, 0, 1, 1], [], []>} : vector<8x8xf32>, vector<8x8xf32>, vector<8x8xf32> -> vector<8x8xf32>
    %cst_34 = arith.constant dense<0xFF800000> : vector<8xf32>
    %60 = vector.multi_reduction <maximumf>, %59, %cst_34 [1] : vector<8x8xf32> to vector<8xf32>
    %61 = vector.shape_cast %60 : vector<8xf32> to vector<8x1xf32>
    %62 = vector.broadcast %61 : vector<8x1xf32> to vector<8x8xf32>
    %63 = arith.subf %59, %62 : vector<8x8xf32>
    %64 = math.exp %63 : vector<8x8xf32>
    %cst_35 = arith.constant dense<0.000000e+00> : vector<8xf32>
    %65 = vector.multi_reduction <add>, %64, %cst_35 [1] : vector<8x8xf32> to vector<8xf32>
    %66 = vector.shape_cast %65 : vector<8xf32> to vector<8x1xf32>
    %67 = vector.broadcast %66 : vector<8x1xf32> to vector<8x8xf32>
    %68 = arith.divf %64, %67 : vector<8x8xf32>
    %c0_36 = arith.constant 0 : index
    %c2 = arith.constant 2 : index
    %c0_37 = arith.constant 0 : index
    %c0_38 = arith.constant 0 : index
    %69 = vector.load %arg4[%c0_36, %c2, %c0_37, %c0_38] : memref<2x4x8x8xf32, #tpu.memory_space<vmem>>, vector<1x1x8x8xf32>
    %70 = vector.shape_cast %69 : vector<1x1x8x8xf32> to vector<8x8xf32>
    %71 = vector.shape_cast %68 : vector<8x8xf32> to vector<1x1x8x8xf32>
    tpu.vector_store %arg4[%c0_36, %c2, %c0_37, %c0_38], %71 {strides = array<i32>} : memref<2x4x8x8xf32, #tpu.memory_space<vmem>>, vector<1x1x8x8xf32>,
    %cst_39 = arith.constant dense<0.000000e+00> : vector<8x8xf32>
    %72 = tpu.matmul %68, %58, %cst_39 {dimension_numbers = #tpu.dot_dimension_numbers<[1], [0], [0], [1], [0, 0, 1, 1], [], []>} : vector<8x8xf32>, vector<8x8xf32>, vector<8x8xf32> -> vector<8x8xf32>
    %73 = vector.extract_strided_slice %19 {offsets = [0, 24], sizes = [8, 8], strides = [1, 1]} : vector<16x96xf32> to vector<8x8xf32>
    %74 = vector.extract_strided_slice %21 {offsets = [24, 0], sizes = [8, 8], strides = [1, 1]} : vector<32x16xf32> to vector<8x8xf32>
    %75 = vector.extract_strided_slice %19 {offsets = [0, 88], sizes = [8, 8], strides = [1, 1]} : vector<16x96xf32> to vector<8x8xf32>
    %cst_40 = arith.constant dense<0.000000e+00> : vector<8x8xf32>
    %76 = tpu.matmul %73, %74, %cst_40 {dimension_numbers = #tpu.dot_dimension_numbers<[1], [0], [0], [1], [0, 0, 1, 1], [], []>} : vector<8x8xf32>, vector<8x8xf32>, vector<8x8xf32> -> vector<8x8xf32>
    %cst_41 = arith.constant dense<0xFF800000> : vector<8xf32>
    %77 = vector.multi_reduction <maximumf>, %76, %cst_41 [1] : vector<8x8xf32> to vector<8xf32>
    %78 = vector.shape_cast %77 : vector<8xf32> to vector<8x1xf32>
    %79 = vector.broadcast %78 : vector<8x1xf32> to vector<8x8xf32>
    %80 = arith.subf %76, %79 : vector<8x8xf32>
    %81 = math.exp %80 : vector<8x8xf32>
    %cst_42 = arith.constant dense<0.000000e+00> : vector<8xf32>
    %82 = vector.multi_reduction <add>, %81, %cst_42 [1] : vector<8x8xf32> to vector<8xf32>
    %83 = vector.shape_cast %82 : vector<8xf32> to vector<8x1xf32>
    %84 = vector.broadcast %83 : vector<8x1xf32> to vector<8x8xf32>
    %85 = arith.divf %81, %84 : vector<8x8xf32>
    %c0_43 = arith.constant 0 : index
    %c3 = arith.constant 3 : index
    %c0_44 = arith.constant 0 : index
    %c0_45 = arith.constant 0 : index
    %86 = vector.load %arg4[%c0_43, %c3, %c0_44, %c0_45] : memref<2x4x8x8xf32, #tpu.memory_space<vmem>>, vector<1x1x8x8xf32>
    %87 = vector.shape_cast %86 : vector<1x1x8x8xf32> to vector<8x8xf32>
    %88 = vector.shape_cast %85 : vector<8x8xf32> to vector<1x1x8x8xf32>
    tpu.vector_store %arg4[%c0_43, %c3, %c0_44, %c0_45], %88 {strides = array<i32>} : memref<2x4x8x8xf32, #tpu.memory_space<vmem>>, vector<1x1x8x8xf32>,
    %cst_46 = arith.constant dense<0.000000e+00> : vector<8x8xf32>
    %89 = tpu.matmul %85, %75, %cst_46 {dimension_numbers = #tpu.dot_dimension_numbers<[1], [0], [0], [1], [0, 0, 1, 1], [], []>} : vector<8x8xf32>, vector<8x8xf32>, vector<8x8xf32> -> vector<8x8xf32>
    %90 = tpu.concatenate %38, %55, %72, %89 in 1 : vector<8x8xf32>, vector<8x8xf32>, vector<8x8xf32>, vector<8x8xf32> -> vector<8x32xf32>
    %91 = vector.extract_strided_slice %19 {offsets = [8, 0], sizes = [8, 8], strides = [1, 1]} : vector<16x96xf32> to vector<8x8xf32>
    %92 = vector.extract_strided_slice %21 {offsets = [0, 8], sizes = [8, 8], strides = [1, 1]} : vector<32x16xf32> to vector<8x8xf32>
    %93 = vector.extract_strided_slice %19 {offsets = [8, 64], sizes = [8, 8], strides = [1, 1]} : vector<16x96xf32> to vector<8x8xf32>
    %cst_47 = arith.constant dense<0.000000e+00> : vector<8x8xf32>
    %94 = tpu.matmul %91, %92, %cst_47 {dimension_numbers = #tpu.dot_dimension_numbers<[1], [0], [0], [1], [0, 0, 1, 1], [], []>} : vector<8x8xf32>, vector<8x8xf32>, vector<8x8xf32> -> vector<8x8xf32>
    %cst_48 = arith.constant dense<0xFF800000> : vector<8xf32>
    %95 = vector.multi_reduction <maximumf>, %94, %cst_48 [1] : vector<8x8xf32> to vector<8xf32>
    %96 = vector.shape_cast %95 : vector<8xf32> to vector<8x1xf32>
    %97 = vector.broadcast %96 : vector<8x1xf32> to vector<8x8xf32>
    %98 = arith.subf %94, %97 : vector<8x8xf32>
    %99 = math.exp %98 : vector<8x8xf32>
    %cst_49 = arith.constant dense<0.000000e+00> : vector<8xf32>
    %100 = vector.multi_reduction <add>, %99, %cst_49 [1] : vector<8x8xf32> to vector<8xf32>
    %101 = vector.shape_cast %100 : vector<8xf32> to vector<8x1xf32>
    %102 = vector.broadcast %101 : vector<8x1xf32> to vector<8x8xf32>
    %103 = arith.divf %99, %102 : vector<8x8xf32>
    %c1_50 = arith.constant 1 : index
    %c0_51 = arith.constant 0 : index
    %c0_52 = arith.constant 0 : index
    %c0_53 = arith.constant 0 : index
    %104 = vector.load %arg4[%c1_50, %c0_51, %c0_52, %c0_53] : memref<2x4x8x8xf32, #tpu.memory_space<vmem>>, vector<1x1x8x8xf32>
    %105 = vector.shape_cast %104 : vector<1x1x8x8xf32> to vector<8x8xf32>
    %106 = vector.shape_cast %103 : vector<8x8xf32> to vector<1x1x8x8xf32>
    tpu.vector_store %arg4[%c1_50, %c0_51, %c0_52, %c0_53], %106 {strides = array<i32>} : memref<2x4x8x8xf32, #tpu.memory_space<vmem>>, vector<1x1x8x8xf32>,
    %cst_54 = arith.constant dense<0.000000e+00> : vector<8x8xf32>
    %107 = tpu.matmul %103, %93, %cst_54 {dimension_numbers = #tpu.dot_dimension_numbers<[1], [0], [0], [1], [0, 0, 1, 1], [], []>} : vector<8x8xf32>, vector<8x8xf32>, vector<8x8xf32> -> vector<8x8xf32>
    %108 = vector.extract_strided_slice %19 {offsets = [8, 8], sizes = [8, 8], strides = [1, 1]} : vector<16x96xf32> to vector<8x8xf32>
    %109 = vector.extract_strided_slice %21 {offsets = [8, 8], sizes = [8, 8], strides = [1, 1]} : vector<32x16xf32> to vector<8x8xf32>
    %110 = vector.extract_strided_slice %19 {offsets = [8, 72], sizes = [8, 8], strides = [1, 1]} : vector<16x96xf32> to vector<8x8xf32>
    %cst_55 = arith.constant dense<0.000000e+00> : vector<8x8xf32>
    %111 = tpu.matmul %108, %109, %cst_55 {dimension_numbers = #tpu.dot_dimension_numbers<[1], [0], [0], [1], [0, 0, 1, 1], [], []>} : vector<8x8xf32>, vector<8x8xf32>, vector<8x8xf32> -> vector<8x8xf32>
    %cst_56 = arith.constant dense<0xFF800000> : vector<8xf32>
    %112 = vector.multi_reduction <maximumf>, %111, %cst_56 [1] : vector<8x8xf32> to vector<8xf32>
    %113 = vector.shape_cast %112 : vector<8xf32> to vector<8x1xf32>
    %114 = vector.broadcast %113 : vector<8x1xf32> to vector<8x8xf32>
    %115 = arith.subf %111, %114 : vector<8x8xf32>
    %116 = math.exp %115 : vector<8x8xf32>
    %cst_57 = arith.constant dense<0.000000e+00> : vector<8xf32>
    %117 = vector.multi_reduction <add>, %116, %cst_57 [1] : vector<8x8xf32> to vector<8xf32>
    %118 = vector.shape_cast %117 : vector<8xf32> to vector<8x1xf32>
    %119 = vector.broadcast %118 : vector<8x1xf32> to vector<8x8xf32>
    %120 = arith.divf %116, %119 : vector<8x8xf32>
    %c1_58 = arith.constant 1 : index
    %c1_59 = arith.constant 1 : index
    %c0_60 = arith.constant 0 : index
    %c0_61 = arith.constant 0 : index
    %121 = vector.load %arg4[%c1_58, %c1_59, %c0_60, %c0_61] : memref<2x4x8x8xf32, #tpu.memory_space<vmem>>, vector<1x1x8x8xf32>
    %122 = vector.shape_cast %121 : vector<1x1x8x8xf32> to vector<8x8xf32>
    %123 = vector.shape_cast %120 : vector<8x8xf32> to vector<1x1x8x8xf32>
    tpu.vector_store %arg4[%c1_58, %c1_59, %c0_60, %c0_61], %123 {strides = array<i32>} : memref<2x4x8x8xf32, #tpu.memory_space<vmem>>, vector<1x1x8x8xf32>,
    %cst_62 = arith.constant dense<0.000000e+00> : vector<8x8xf32>
    %124 = tpu.matmul %120, %110, %cst_62 {dimension_numbers = #tpu.dot_dimension_numbers<[1], [0], [0], [1], [0, 0, 1, 1], [], []>} : vector<8x8xf32>, vector<8x8xf32>, vector<8x8xf32> -> vector<8x8xf32>
    %125 = vector.extract_strided_slice %19 {offsets = [8, 16], sizes = [8, 8], strides = [1, 1]} : vector<16x96xf32> to vector<8x8xf32>
    %126 = vector.extract_strided_slice %21 {offsets = [16, 8], sizes = [8, 8], strides = [1, 1]} : vector<32x16xf32> to vector<8x8xf32>
    %127 = vector.extract_strided_slice %19 {offsets = [8, 80], sizes = [8, 8], strides = [1, 1]} : vector<16x96xf32> to vector<8x8xf32>
    %cst_63 = arith.constant dense<0.000000e+00> : vector<8x8xf32>
    %128 = tpu.matmul %125, %126, %cst_63 {dimension_numbers = #tpu.dot_dimension_numbers<[1], [0], [0], [1], [0, 0, 1, 1], [], []>} : vector<8x8xf32>, vector<8x8xf32>, vector<8x8xf32> -> vector<8x8xf32>
    %cst_64 = arith.constant dense<0xFF800000> : vector<8xf32>
    %129 = vector.multi_reduction <maximumf>, %128, %cst_64 [1] : vector<8x8xf32> to vector<8xf32>
    %130 = vector.shape_cast %129 : vector<8xf32> to vector<8x1xf32>
    %131 = vector.broadcast %130 : vector<8x1xf32> to vector<8x8xf32>
    %132 = arith.subf %128, %131 : vector<8x8xf32>
    %133 = math.exp %132 : vector<8x8xf32>
    %cst_65 = arith.constant dense<0.000000e+00> : vector<8xf32>
    %134 = vector.multi_reduction <add>, %133, %cst_65 [1] : vector<8x8xf32> to vector<8xf32>
    %135 = vector.shape_cast %134 : vector<8xf32> to vector<8x1xf32>
    %136 = vector.broadcast %135 : vector<8x1xf32> to vector<8x8xf32>
    %137 = arith.divf %133, %136 : vector<8x8xf32>
    %c1_66 = arith.constant 1 : index
    %c2_67 = arith.constant 2 : index
    %c0_68 = arith.constant 0 : index
    %c0_69 = arith.constant 0 : index
    %138 = vector.load %arg4[%c1_66, %c2_67, %c0_68, %c0_69] : memref<2x4x8x8xf32, #tpu.memory_space<vmem>>, vector<1x1x8x8xf32>
    %139 = vector.shape_cast %138 : vector<1x1x8x8xf32> to vector<8x8xf32>
    %140 = vector.shape_cast %137 : vector<8x8xf32> to vector<1x1x8x8xf32>
    tpu.vector_store %arg4[%c1_66, %c2_67, %c0_68, %c0_69], %140 {strides = array<i32>} : memref<2x4x8x8xf32, #tpu.memory_space<vmem>>, vector<1x1x8x8xf32>,
    %cst_70 = arith.constant dense<0.000000e+00> : vector<8x8xf32>
    %141 = tpu.matmul %137, %127, %cst_70 {dimension_numbers = #tpu.dot_dimension_numbers<[1], [0], [0], [1], [0, 0, 1, 1], [], []>} : vector<8x8xf32>, vector<8x8xf32>, vector<8x8xf32> -> vector<8x8xf32>
    %142 = vector.extract_strided_slice %19 {offsets = [8, 24], sizes = [8, 8], strides = [1, 1]} : vector<16x96xf32> to vector<8x8xf32>
    %143 = vector.extract_strided_slice %21 {offsets = [24, 8], sizes = [8, 8], strides = [1, 1]} : vector<32x16xf32> to vector<8x8xf32>
    %144 = vector.extract_strided_slice %19 {offsets = [8, 88], sizes = [8, 8], strides = [1, 1]} : vector<16x96xf32> to vector<8x8xf32>
    %cst_71 = arith.constant dense<0.000000e+00> : vector<8x8xf32>
    %145 = tpu.matmul %142, %143, %cst_71 {dimension_numbers = #tpu.dot_dimension_numbers<[1], [0], [0], [1], [0, 0, 1, 1], [], []>} : vector<8x8xf32>, vector<8x8xf32>, vector<8x8xf32> -> vector<8x8xf32>
    %cst_72 = arith.constant dense<0xFF800000> : vector<8xf32>
    %146 = vector.multi_reduction <maximumf>, %145, %cst_72 [1] : vector<8x8xf32> to vector<8xf32>
    %147 = vector.shape_cast %146 : vector<8xf32> to vector<8x1xf32>
    %148 = vector.broadcast %147 : vector<8x1xf32> to vector<8x8xf32>
    %149 = arith.subf %145, %148 : vector<8x8xf32>
    %150 = math.exp %149 : vector<8x8xf32>
    %cst_73 = arith.constant dense<0.000000e+00> : vector<8xf32>
    %151 = vector.multi_reduction <add>, %150, %cst_73 [1] : vector<8x8xf32> to vector<8xf32>
    %152 = vector.shape_cast %151 : vector<8xf32> to vector<8x1xf32>
    %153 = vector.broadcast %152 : vector<8x1xf32> to vector<8x8xf32>
    %154 = arith.divf %150, %153 : vector<8x8xf32>
    %c1_74 = arith.constant 1 : index
    %c3_75 = arith.constant 3 : index
    %c0_76 = arith.constant 0 : index
    %c0_77 = arith.constant 0 : index
    %155 = vector.load %arg4[%c1_74, %c3_75, %c0_76, %c0_77] : memref<2x4x8x8xf32, #tpu.memory_space<vmem>>, vector<1x1x8x8xf32>
    %156 = vector.shape_cast %155 : vector<1x1x8x8xf32> to vector<8x8xf32>
    %157 = vector.shape_cast %154 : vector<8x8xf32> to vector<1x1x8x8xf32>
    tpu.vector_store %arg4[%c1_74, %c3_75, %c0_76, %c0_77], %157 {strides = array<i32>} : memref<2x4x8x8xf32, #tpu.memory_space<vmem>>, vector<1x1x8x8xf32>,
    %cst_78 = arith.constant dense<0.000000e+00> : vector<8x8xf32>
    %158 = tpu.matmul %154, %144, %cst_78 {dimension_numbers = #tpu.dot_dimension_numbers<[1], [0], [0], [1], [0, 0, 1, 1], [], []>} : vector<8x8xf32>, vector<8x8xf32>, vector<8x8xf32> -> vector<8x8xf32>
    %159 = tpu.concatenate %107, %124, %141, %158 in 1 : vector<8x8xf32>, vector<8x8xf32>, vector<8x8xf32>, vector<8x8xf32> -> vector<8x32xf32>
    %160 = tpu.concatenate %90, %159 in 0 : vector<8x32xf32>, vector<8x32xf32> -> vector<16x32xf32>
    %cst_79 = arith.constant dense<0.000000e+00> : vector<16x32xf32>
    %161 = tpu.matmul %160, %1, %cst_79 {dimension_numbers = #tpu.dot_dimension_numbers<[1], [0], [0], [1], [0, 0, 1, 1], [], []>} : vector<16x32xf32>, vector<32x32xf32>, vector<16x32xf32> -> vector<16x32xf32>
    %162 = vector.broadcast %6 : vector<1x32xf32> to vector<16x32xf32>
    %163 = arith.addf %161, %162 : vector<16x32xf32>
    %164 = arith.addf %16, %163 : vector<16x32xf32>
    %cst_80 = arith.constant dense<0.000000e+00> : vector<16xf32>
    %165 = vector.multi_reduction <add>, %164, %cst_80 [1] : vector<16x32xf32> to vector<16xf32>
    %166 = vector.shape_cast %165 : vector<16xf32> to vector<16x1xf32>
    %cst_81 = arith.constant 3.200000e+01 : f32
    %167 = vector.broadcast %cst_81 : f32 to vector<16x1xf32>
    %168 = arith.divf %166, %167 : vector<16x1xf32>
    %169 = vector.broadcast %168 : vector<16x1xf32> to vector<16x32xf32>
    %170 = arith.subf %164, %169 : vector<16x32xf32>
    %171 = arith.mulf %170, %170 : vector<16x32xf32>
    %cst_82 = arith.constant dense<0.000000e+00> : vector<16xf32>
    %172 = vector.multi_reduction <add>, %171, %cst_82 [1] : vector<16x32xf32> to vector<16xf32>
    %173 = vector.shape_cast %172 : vector<16xf32> to vector<16x1xf32>
    %cst_83 = arith.constant 3.200000e+01 : f32
    %174 = vector.broadcast %cst_83 : f32 to vector<16x1xf32>
    %175 = arith.divf %173, %174 : vector<16x1xf32>
    %cst_84 = arith.constant 9.99999974E-6 : f32
    %176 = vector.broadcast %cst_84 : f32 to vector<16x1xf32>
    %177 = arith.addf %175, %176 : vector<16x1xf32>
    %178 = math.rsqrt %177 : vector<16x1xf32>
    %179 = vector.broadcast %168 : vector<16x1xf32> to vector<16x32xf32>
    %180 = arith.subf %164, %179 : vector<16x32xf32>
    %181 = vector.broadcast %178 : vector<16x1xf32> to vector<16x32xf32>
    %182 = arith.mulf %180, %181 : vector<16x32xf32>
    %183 = vector.broadcast %7 : vector<1x32xf32> to vector<16x32xf32>
    %184 = arith.mulf %182, %183 : vector<16x32xf32>
    %185 = vector.broadcast %8 : vector<1x32xf32> to vector<16x32xf32>
    %186 = arith.addf %184, %185 : vector<16x32xf32>
    %cst_85 = arith.constant dense<0.000000e+00> : vector<16x64xf32>
    %187 = tpu.matmul %186, %2, %cst_85 {dimension_numbers = #tpu.dot_dimension_numbers<[1], [0], [0], [1], [0, 0, 1, 1], [], []>} : vector<16x32xf32>, vector<32x64xf32>, vector<16x64xf32> -> vector<16x64xf32>
    %188 = vector.broadcast %5 : vector<1x64xf32> to vector<16x64xf32>
    %189 = arith.addf %187, %188 : vector<16x64xf32>
    %cst_86 = arith.constant 0.000000e+00 : f32
    %190 = vector.broadcast %cst_86 : f32 to vector<16x64xf32>
    %191 = arith.maximumf %189, %190 : vector<16x64xf32>
    %cst_87 = arith.constant dense<0.000000e+00> : vector<16x32xf32>
    %192 = tpu.matmul %191, %3, %cst_87 {dimension_numbers = #tpu.dot_dimension_numbers<[1], [0], [0], [1], [0, 0, 1, 1], [], []>} : vector<16x64xf32>, vector<64x32xf32>, vector<16x32xf32> -> vector<16x32xf32>
    %193 = vector.broadcast %9 : vector<1x32xf32> to vector<16x32xf32>
    %194 = arith.addf %192, %193 : vector<16x32xf32>
    %195 = arith.addf %186, %194 : vector<16x32xf32>
    %cst_88 = arith.constant dense<0.000000e+00> : vector<16xf32>
    %196 = vector.multi_reduction <add>, %195, %cst_88 [1] : vector<16x32xf32> to vector<16xf32>
    %197 = vector.shape_cast %196 : vector<16xf32> to vector<16x1xf32>
    %cst_89 = arith.constant 3.200000e+01 : f32
    %198 = vector.broadcast %cst_89 : f32 to vector<16x1xf32>
    %199 = arith.divf %197, %198 : vector<16x1xf32>
    %200 = vector.broadcast %199 : vector<16x1xf32> to vector<16x32xf32>
    %201 = arith.subf %195, %200 : vector<16x32xf32>
    %202 = arith.mulf %201, %201 : vector<16x32xf32>
    %cst_90 = arith.constant dense<0.000000e+00> : vector<16xf32>
    %203 = vector.multi_reduction <add>, %202, %cst_90 [1] : vector<16x32xf32> to vector<16xf32>
    %204 = vector.shape_cast %203 : vector<16xf32> to vector<16x1xf32>
    %cst_91 = arith.constant 3.200000e+01 : f32
    %205 = vector.broadcast %cst_91 : f32 to vector<16x1xf32>
    %206 = arith.divf %204, %205 : vector<16x1xf32>
    %cst_92 = arith.constant 9.99999974E-6 : f32
    %207 = vector.broadcast %cst_92 : f32 to vector<16x1xf32>
    %208 = arith.addf %206, %207 : vector<16x1xf32>
    %209 = math.rsqrt %208 : vector<16x1xf32>
    %210 = vector.broadcast %199 : vector<16x1xf32> to vector<16x32xf32>
    %211 = arith.subf %195, %210 : vector<16x32xf32>
    %212 = vector.broadcast %209 : vector<16x1xf32> to vector<16x32xf32>
    %213 = arith.mulf %211, %212 : vector<16x32xf32>
    %214 = vector.broadcast %10 : vector<1x32xf32> to vector<16x32xf32>
    %215 = arith.mulf %213, %214 : vector<16x32xf32>
    %216 = vector.broadcast %11 : vector<1x32xf32> to vector<16x32xf32>
    %217 = arith.addf %215, %216 : vector<16x32xf32>
    %218 = vector.extract_strided_slice %217 {offsets = [0, 0], sizes = [8, 32], strides = [1, 1]} : vector<16x32xf32> to vector<8x32xf32>
    %c0_93 = arith.constant 0 : index
    %c0_94 = arith.constant 0 : index
    %c0_95 = arith.constant 0 : index
    %219 = vector.load %arg3[%c0_93, %c0_94, %c0_95] : memref<2x8x32xf32, #tpu.memory_space<vmem>>, vector<1x8x32xf32>
    %220 = vector.shape_cast %219 : vector<1x8x32xf32> to vector<8x32xf32>
    %221 = vector.shape_cast %218 : vector<8x32xf32> to vector<1x8x32xf32>
    tpu.vector_store %arg3[%c0_93, %c0_94, %c0_95], %221 {strides = array<i32>} : memref<2x8x32xf32, #tpu.memory_space<vmem>>, vector<1x8x32xf32>,
    %222 = vector.extract_strided_slice %217 {offsets = [8, 0], sizes = [8, 32], strides = [1, 1]} : vector<16x32xf32> to vector<8x32xf32>
    %c1_96 = arith.constant 1 : index
    %c0_97 = arith.constant 0 : index
    %c0_98 = arith.constant 0 : index
    %223 = vector.load %arg3[%c1_96, %c0_97, %c0_98] : memref<2x8x32xf32, #tpu.memory_space<vmem>>, vector<1x8x32xf32>
    %224 = vector.shape_cast %223 : vector<1x8x32xf32> to vector<8x32xf32>
    %225 = vector.shape_cast %222 : vector<8x32xf32> to vector<1x8x32xf32>
    tpu.vector_store %arg3[%c1_96, %c0_97, %c0_98], %225 {strides = array<i32>} : memref<2x8x32xf32, #tpu.memory_space<vmem>>, vector<1x8x32xf32>,
    return
  }
  func.func @transform_0(%arg0: i32) -> (i32, i32, i32) {
    %c0_i32 = arith.constant 0 : i32
    %c0_i32_0 = arith.constant 0 : i32
    %c0_i32_1 = arith.constant 0 : i32
    %c0_i32_2 = arith.constant 0 : i32
    return %c0_i32, %c0_i32_0, %c0_i32_1 : i32, i32, i32
  }
  func.func @transform_1(%arg0: i32) -> (i32, i32) {
    %c0_i32 = arith.constant 0 : i32
    %c0_i32_0 = arith.constant 0 : i32
    %c0_i32_1 = arith.constant 0 : i32
    return %c0_i32, %c0_i32_0 : i32, i32
  }
  func.func @transform_2(%arg0: i32) -> (i32, i32, i32) {
    %c0_i32 = arith.constant 0 : i32
    %c0_i32_0 = arith.constant 0 : i32
    %c0_i32_1 = arith.constant 0 : i32
    %c0_i32_2 = arith.constant 0 : i32
    return %c0_i32, %c0_i32_0, %c0_i32_1 : i32, i32, i32
  }
  func.func @transform_3(%arg0: i32) -> (i32, i32, i32, i32) {
    %c0_i32 = arith.constant 0 : i32
    %c0_i32_0 = arith.constant 0 : i32
    %c0_i32_1 = arith.constant 0 : i32
    %c0_i32_2 = arith.constant 0 : i32
    %c0_i32_3 = arith.constant 0 : i32
    return %c0_i32, %c0_i32_0, %c0_i32_1, %c0_i32_2 : i32, i32, i32, i32
  }
}

</mosaic_0001>

<bundles_post_ra>
// kernel: transformer_block.1
= control target key start
LH: loop header
LB: loop body
LE: loop exit
PB: predicated region body
PF: predicated region fallthrough
CT: control target
= control target key end

     0   :  { %9 = vsyncpa [#allocation3], 0  ;;  %s2615_s0 = inlined_call_operand.hbm [shape: f32[2,8,32], index: 0, kind: input, shape index: {}]   ;;  %s2616_s1 = inlined_call_operand.hbm [shape: f32[168,128], index: 1, kind: input, shape index: {}]   ;;  %s2617_s2 = inlined_call_operand.hbm [shape: f32[2,8,32], index: 2, kind: output, shape index: {0}]   ;;  %s2618_s3 = inlined_call_operand.hbm [shape: f32[2,4,8,8], index: 3, kind: output, shape index: {1}]  }
   0x1   :  { %10 = vsyncpa [#allocation6], 0 }
   0x2   :  { %11 = vsyncpa [#allocation4], 0 }
   0x3   :  { %12 = vsyncpa [#allocation9], 0  ;;  %s2331_s12 = smov [#allocation2]   ;;  %s2235_s16 = scalar_lea.hbm %s2615_s0, 256 }
   0x4   :  { %s18_s13 = sshll.u32 %s2331_s12, 4  ;;  %p2236_p0 = scmp.ne.s32.totalorder %s2615_s0, %s2235_s16  ;;  %s19_s13 = int_to_ptr.vmem [resolvable:$true] %s18_s13 }
   0x5   :  { %p2239_p1 = scmp.lt.u32.totalorder %s2235_s16, %s2615_s0 }
   0x7   :  { %p2241_p2 = pnand %p2239_p1, %p2236_p0 }
   0x9   :  { %2244 = shalt.err (!%p2241_p2)
}
   0xa   :  { %s2245_s21 = scalar_lea.vmem %s19_s13, 256  ;;  %p2250_p4 = scmp.lt.s32.totalorder %s19_s13, %s19_s13 }
   0xb   :  { %p2246_p3 = scmp.ne.s32.totalorder %s19_s13, %s2245_s21  ;;  %p2251_p5 = scmp.lt.s32.totalorder %s2245_s21, %s2245_s21 }
   0xd   :  { %p2252_p6 = por %p2251_p5, %p2250_p4 }
   0xf   :  { %p2253_p7 = pnand %p2252_p6, %p2246_p3 }
  0x11   :  { %2256 = shalt.err (!%p2253_p7)
}
  0x12   :  { %s2332_s22 = smov 128   ;;  %s2333_s23 = smov 8  }
  0x13   :  { %24 = dma.hbm_to_vmem [thread:$0]  %s2615_s0, 256, %s19_s13, [#allocation3], %s2332_s22, %s2332_s22, %s2333_s23  }
  0x14   :  { %s2334_s26 = smov [#allocation5]   ;;  %s2257_s30 = scalar_lea.hbm %s2616_s1, 2688 }
  0x15   :  { %s30_s27 = sshll.u32 %s2334_s26, 4  ;;  %p2258_p8 = scmp.ne.s32.totalorder %s2616_s1, %s2257_s30  ;;  %s31_s27 = int_to_ptr.vmem [resolvable:$true] %s30_s27 }
  0x16   :  { %p2261_p9 = scmp.lt.u32.totalorder %s2257_s30, %s2616_s1 }
  0x18   :  { %p2263_p10 = pnand %p2261_p9, %p2258_p8 }
  0x1a   :  { %2266 = shalt.err (!%p2263_p10)
}
  0x1b   :  { %s2267_s8 = scalar_lea.vmem %s31_s27, 2688  ;;  %p2272_p12 = scmp.lt.s32.totalorder %s31_s27, %s31_s27 }
  0x1c   :  { %p2268_p11 = scmp.ne.s32.totalorder %s31_s27, %s2267_s8  ;;  %p2273_p13 = scmp.lt.s32.totalorder %s2267_s8, %s2267_s8 }
  0x1e   :  { %p2274_p0 = por %p2273_p13, %p2272_p12 }
  0x20   :  { %p2275_p1 = pnand %p2274_p0, %p2268_p11 }
  0x22   :  { %2278 = shalt.err (!%p2275_p1)
}
  0x23   :  { %36 = dma.hbm_to_vmem [thread:$0]  %s2616_s1, 2688, %s31_s27, [#allocation6], %s2332_s22, %s2332_s22, %s2333_s23  }
  0x24   :  { %2323 = dma.done.wait [#allocation3], 256  }
  0x25   :  { %2324 = vsyncadd [#allocation3], 4294967040 }
  0x26   :  { %2325 = dma.done.wait [#allocation6], 2688  }
  0x27   :  { %2326 = vsyncadd [#allocation6], 4294964608  ;;  %vm78_vm0 = vcmask 261120   ;;  %v43_v0 = vld [vmem:[#allocation5] sm:$0xff]  ;;  %v44_v1 = vld [vmem:[#allocation5 + $0x8] sm:$0xff]  ;;  %v2335_v8 = vmov 0.0  }
  0x28   :  { %v45_v2 = vld [vmem:[#allocation5 + $0x10] sm:$0xff]  ;;  %v2134_v3 = vpack.c.bf16 %v44_v1, %v43_v0  ;;  %v46_v4 = vld [vmem:[#allocation5 + $0x18] sm:$0xff]  ;;  %2023 = vmatprep.subr.mxu0 %v2335_v8  ;;  %vm2336_vm1 = vmmov 0   ;;  %v1902_v9 = vld [vmem:[#allocation5 + $0xa0] ss:$0 sm:$0xff]  ;;  %s2337_s1 = smov 120  }
  0x29   :  { %v2402_v5 = vld [vmem:[#allocation2] sm:$0xff]  ;;  %v2138_v6 = vpack.c.bf16 %v46_v4, %v45_v2  ;;  %v2406_v7 = vld [vmem:[#allocation2 + $0x8] sm:$0xff]  ;;  %2025 = vmatprep.mubr.msk.f32.mxu0 %vm2336_vm1, %v2335_v8  ;;  %s2338_s10 = smov 96   ;;  %s2339_s11 = smov 80   ;;  %vm163_vm2 = vcmask 64512   ;;  %vm840_vm3 = vcmask 130048  }
  0x2a   :  { %2010 = vmatprep.mubr.msk.f32.mxu1 %vm78_vm0, %v2402_v5  ;;  %2135 = vmatprep.subr.bf16.mxu1 %v2134_v3  ;;  %s2340_s12 = smov 88   ;;  %s2341_s13 = smov 72   ;;  %vm842_vm4 = vcmask 195584   ;;  %vm1743_vm5 = vcmask 523264  }
  0x2b   :  { %2137 = vmatpush3.bf16.msra.mxu1 %v2134_v3  ;;  %s2342_s14 = smov 112   ;;  %s2343_s15 = smov 104  }
  0x2c   :  { %2139 = vmatprep.subr.bf16.mxu1 %v2138_v6  ;;  %s2344_s16 = smov 56   ;;  %s2345_s17 = smov 64  }
  0x2d   :  { %s2346_s18 = smov 40   ;;  %s2347_s19 = smov 48  }
  0x2e   :  { %s2348_s20 = smov 16   ;;  %s2349_s21 = smov 24  }
  0x2f   :  { %2141 = vmatpush3.bf16.msra.mxu1 %v2138_v6  ;;  %s2350_s24 = smov [#allocation8]  }
  0x30   :  { %2013 = vmatprep.subr.mxu1 %v2335_v8  ;;  %s1885_s25 = sshll.u32 %s2350_s24, 4  ;;  %s1886_s25 = int_to_ptr.vmem [resolvable:$true] %s1885_s25 }
  0x31   :  { %s2279_s26 = scalar_lea.vmem %s1886_s25, 1024  ;;  %p2284_p3 = scmp.lt.s32.totalorder %s1886_s25, %s1886_s25 }
  0x32   :  { %2011 = vmatmul.mubr.msk.f32.vlgmr.msra.gmra.mrb[0].mxu1 %vm78_vm0, %v2406_v7  ;;  %p2280_p2 = scmp.ne.s32.totalorder %s1886_s25, %s2279_s26  ;;  %p2285_p4 = scmp.lt.s32.totalorder %s2279_s26, %s2279_s26 }
  0x33   :  { %2015 = vmatprep.mubr.msk.f32.mxu1 %vm2336_vm1, %v2335_v8 }
  0x34   :  { %p2286_p5 = por %p2285_p4, %p2284_p3 }
  0x36   :  { %p2287_p6 = pnand %p2286_p5, %p2280_p2 }
 0x105   :  { %v2012_v10 = vpop.f32.mrb[0].mxu1 }
 0x106   :  { %v151_v11 = vpop.f32.mrb[1].mxu1  ;;  %v2424_v13 = vadd.f32 %v2012_v10, %v1902_v9 }
 0x107   :  { %v2416_v12 = vadd.f32 %v1902_v9, %v151_v11 }
 0x109   :  { %326 = vrot.lane.b32.xlu1 %v2416_v12, %s2337_s1  ;;  %161 = vrot.lane.b32.xlu0 %v2416_v12, %s2338_s10 }
 0x10d   :  { %495 = vrot.lane.b32.xlu1 %v2416_v12, %s2339_s11  ;;  %328 = vrot.lane.b32.xlu0 %v2416_v12, %s2340_s12 }
 0x111   :  { %662 = vrot.lane.b32.xlu1 %v2416_v12, %s2341_s13  ;;  %493 = vrot.lane.b32.xlu0 %v2416_v12, %s2342_s14 }
 0x115   :  { %845 = vrot.lane.b32.xlu1 %v2424_v13, %s2338_s10  ;;  %660 = vrot.lane.b32.xlu0 %v2416_v12, %s2343_s15 }
 0x119   :  { %1010 = vrot.lane.b32.xlu1 %v2424_v13, %s2337_s1  ;;  %1012 = vrot.lane.b32.xlu0 %v2424_v13, %s2340_s12 }
 0x11d   :  { %1177 = vrot.lane.b32.xlu1 %v2424_v13, %s2342_s14  ;;  %1179 = vrot.lane.b32.xlu0 %v2424_v13, %s2339_s11 }
 0x121   :  { %1344 = vrot.lane.b32.xlu1 %v2424_v13, %s2343_s15  ;;  %1346 = vrot.lane.b32.xlu0 %v2424_v13, %s2341_s13 }
 0x125   :  { %417 = vrot.lane.b32.xlu1 %v2416_v12, %s2344_s16  ;;  %250 = vrot.lane.b32.xlu0 %v2416_v12, %s2345_s17 }
 0x17b   :  { %v327_v14 = vpop.permute.xlu1 %326  ;;  %v162_v15 = vpop.permute.xlu0 %161 }
 0x17c   :  { %2014 = vmatpush3.xpose.msk.msra.mxu1 %vm163_vm2, %v162_v15 }
 0x17d   :  { %2018 = vmatprep.subr.mxu1 %v2335_v8 }
 0x17f   :  { %v496_v16 = vpop.permute.xlu1 %495  ;;  %2016 = vmatmul.mubr.msk.f32.vlgmr.msra.gmra.mrb[2].mxu1 %vm163_vm2, %v2416_v12  ;;  %v329_v17 = vpop.permute.xlu0 %328 }
 0x180   :  { %2024 = vmatpush3.xpose.msk.msra.mxu0 %vm163_vm2, %v329_v17  ;;  %2020 = vmatprep.mubr.msk.f32.mxu1 %vm2336_vm1, %v2335_v8 }
 0x181   :  { %2033 = vmatprep.subr.mxu0 %v2335_v8 }
 0x183   :  { %v663_v18 = vpop.permute.xlu1 %662  ;;  %2026 = vmatmul.mubr.msk.f32.vlgmr.msra.gmra.mrb[0].mxu0 %vm163_vm2, %v327_v14  ;;  %v494_v19 = vpop.permute.xlu0 %493 }
 0x184   :  { %2034 = vmatpush3.xpose.msk.msra.mxu0 %vm163_vm2, %v496_v16  ;;  %2035 = vmatprep.mubr.msk.f32.mxu0 %vm2336_vm1, %v2335_v8 }
 0x185   :  { %2043 = vmatprep.subr.mxu0 %v2335_v8 }
 0x187   :  { %2036 = vmatmul.mubr.msk.f32.vlgmr.msra.gmra.mrb[2].mxu0 %vm163_vm2, %v494_v19  ;;  %v661_v20 = vpop.permute.xlu0 %660  ;;  %v846_v21 = vpop.permute.xlu1 %845 }
 0x188   :  { %2044 = vmatpush3.xpose.msk.msra.mxu0 %vm163_vm2, %v663_v18  ;;  %2045 = vmatprep.mubr.msk.f32.mxu0 %vm2336_vm1, %v2335_v8 }
 0x189   :  { %2053 = vmatprep.subr.mxu0 %v2335_v8 }
 0x18b   :  { %2046 = vmatmul.mubr.msk.f32.vlgmr.msra.gmra.mrb[4].mxu0 %vm163_vm2, %v661_v20  ;;  %v1013_v22 = vpop.permute.xlu0 %1012  ;;  %v1011_v23 = vpop.permute.xlu1 %1010 }
 0x18c   :  { %2054 = vmatpush3.xpose.msk.msra.mxu0 %vm163_vm2, %v846_v21  ;;  %2055 = vmatprep.mubr.msk.f32.mxu0 %vm2336_vm1, %v2335_v8 }
 0x18d   :  { %2063 = vmatprep.subr.mxu0 %v2335_v8 }
 0x18f   :  { %2056 = vmatmul.mubr.msk.f32.vlgmr.msra.gmra.mrb[6].mxu0 %vm163_vm2, %v2424_v13  ;;  %v1180_v24 = vpop.permute.xlu0 %1179  ;;  %v1178_v26 = vpop.permute.xlu1 %1177 }
 0x190   :  { %2064 = vmatpush3.xpose.msk.msra.mxu0 %vm163_vm2, %v1013_v22  ;;  %2065 = vmatprep.mubr.msk.f32.mxu0 %vm2336_vm1, %v2335_v8 }
 0x191   :  { %2073 = vmatprep.subr.mxu0 %v2335_v8 }
 0x193   :  { %2066 = vmatmul.mubr.msk.f32.vlgmr.msra.gmra.mrb[8].mxu0 %vm163_vm2, %v1011_v23  ;;  %v1347_v25 = vpop.permute.xlu0 %1346  ;;  %v1345_v28 = vpop.permute.xlu1 %1344 }
 0x194   :  { %2074 = vmatpush3.xpose.msk.msra.mxu0 %vm163_vm2, %v1180_v24  ;;  %2075 = vmatprep.mubr.msk.f32.mxu0 %vm2336_vm1, %v2335_v8 }
 0x195   :  { %2083 = vmatprep.subr.mxu0 %v2335_v8 }
 0x197   :  { %2076 = vmatmul.mubr.msk.f32.vlgmr.msra.gmra.mrb[10].mxu0 %vm163_vm2, %v1178_v26  ;;  %v251_v27 = vpop.permute.xlu0 %250  ;;  %v2490_v53 = vpop.permute.xlu1 %417 }
 0x198   :  { %2019 = vmatpush3.msra.mxu1 %v251_v27  ;;  %2084 = vmatpush3.xpose.msk.msra.mxu0 %vm163_vm2, %v1347_v25 }
 0x199   :  { %2085 = vmatprep.mubr.msk.f32.mxu0 %vm2336_vm1, %v2335_v8  ;;  %2028 = vmatprep.subr.mxu1 %v2335_v8 }
 0x19b   :  { %2086 = vmatmul.mubr.msk.f32.vlgmr.msra.gmra.mrb[12].mxu0 %vm163_vm2, %v1345_v28 }
 0x252   :  { %v234_v29 = vpop.f32.mrb[2].mxu1 }
 0x253   :  { %v2017_v30 = vpop.f32.mrb[3].mxu1  ;;  %v238_v31 = vsel %vm163_vm2, %v234_v29, -inf }
 0x254   :  { %239 = vmax.xlane.f32.xlu0 %v238_v31 }
 0x256   :  { %v400_v32 = vpop.f32.mrb[0].mxu0 }
 0x257   :  { %v2027_v33 = vpop.f32.mrb[1].mxu0  ;;  %v404_v34 = vsel %vm163_vm2, %v400_v32, -inf }
 0x258   :  { %405 = vmax.xlane.f32.xlu1 %v404_v34 }
 0x25a   :  { %v567_v35 = vpop.f32.mrb[2].mxu0 }
 0x25b   :  { %v2037_v36 = vpop.f32.mrb[3].mxu0  ;;  %v571_v37 = vsel %vm163_vm2, %v567_v35, -inf }
 0x25c   :  { %572 = vmax.xlane.f32.xlu0 %v571_v37 }
 0x25e   :  { %v734_v38 = vpop.f32.mrb[4].mxu0 }
 0x25f   :  { %v2047_v39 = vpop.f32.mrb[5].mxu0  ;;  %v738_v40 = vsel %vm163_vm2, %v734_v38, -inf }
 0x260   :  { %739 = vmax.xlane.f32.xlu0 %v738_v40 }
 0x262   :  { %v917_v41 = vpop.f32.mrb[6].mxu0 }
 0x263   :  { %v2057_v42 = vpop.f32.mrb[7].mxu0  ;;  %v921_v43 = vsel %vm163_vm2, %v917_v41, -inf }
 0x264   :  { %922 = vmax.xlane.f32.xlu1 %v921_v43 }
 0x266   :  { %v1084_v44 = vpop.f32.mrb[8].mxu0 }
 0x267   :  { %v2067_v45 = vpop.f32.mrb[9].mxu0  ;;  %v1088_v46 = vsel %vm163_vm2, %v1084_v44, -inf }
 0x268   :  { %1089 = vmax.xlane.f32.xlu0 %v1088_v46 }
 0x26a   :  { %v1251_v47 = vpop.f32.mrb[10].mxu0 }
 0x26b   :  { %v2077_v48 = vpop.f32.mrb[11].mxu0  ;;  %v1255_v49 = vsel %vm163_vm2, %v1251_v47, -inf }
 0x26c   :  { %1256 = vmax.xlane.f32.xlu1 %v1255_v49 }
 0x26e   :  { %v1418_v50 = vpop.f32.mrb[12].mxu0 }
 0x26f   :  { %v2087_v51 = vpop.f32.mrb[13].mxu0  ;;  %v1422_v52 = vsel %vm163_vm2, %v1418_v50, -inf }
 0x270   :  { %1423 = vmax.xlane.f32.xlu0 %v1422_v52 }
 0x27d   :  { %751 = vrot.lane.b32.xlu1 %v2416_v12, %s2346_s18 }
 0x286   :  { %584 = vrot.lane.b32.xlu0 %v2416_v12, %s2347_s19 }
 0x2e1   :  { %v240_v54 = vpop.xlane.xlu0 %239 }
 0x2e2   :  { %v241_v55 = vsub.f32 %v234_v29, %v240_v54 }
 0x2e4   :  { %v242_v56 = vmul.f32 1.442695, %v241_v55 }
 0x2e5   :  { %v406_v57 = vpop.xlane.xlu1 %405 }
 0x2e6   :  { %2195 = vpow2.f32 %v242_v56  ;;  %v407_v58 = vsub.f32 %v400_v32, %v406_v57 }
 0x2e8   :  { %v408_v59 = vmul.f32 1.442695, %v407_v58 }
 0x2e9   :  { %v573_v60 = vpop.xlane.xlu0 %572 }
 0x2ea   :  { %2197 = vpow2.f32 %v408_v59  ;;  %v574_v61 = vsub.f32 %v567_v35, %v573_v60 }
 0x2ec   :  { %v575_v62 = vmul.f32 1.442695, %v574_v61 }
 0x2ed   :  { %v740_v63 = vpop.xlane.xlu0 %739 }
 0x2ee   :  { %2199 = vpow2.f32 %v575_v62  ;;  %v741_v0 = vsub.f32 %v734_v38, %v740_v63 }
 0x2f0   :  { %v2196_v1 = vpop.eup %2195  ;;  %v742_v2 = vmul.f32 1.442695, %v741_v0 }
 0x2f1   :  { %v244_v3 = vsel %vm163_vm2, %v2196_v1, 0.0  ;;  %v923_v14 = vpop.xlane.xlu1 %922 }
 0x2f2   :  { %2201 = vpow2.f32 %v742_v2  ;;  %245 = vadd.xlane.f32.xlu1 %v244_v3  ;;  %v924_v15 = vsub.f32 %v917_v41, %v923_v14  ;;  %v50_v14 = vld [vmem:[#allocation5 + $0x38] sm:$0xff] }
 0x2f4   :  { %v2198_v4 = vpop.eup %2197  ;;  %v925_v19 = vmul.f32 1.442695, %v924_v15 }
 0x2f5   :  { %v410_v6 = vsel %vm163_vm2, %v2198_v4, 0.0  ;;  %v1090_v16 = vpop.xlane.xlu0 %1089 }
 0x2f6   :  { %411 = vadd.xlane.f32.xlu0 %v410_v6  ;;  %v1091_v18 = vsub.f32 %v1084_v44, %v1090_v16  ;;  %2203 = vpow2.f32 %v925_v19 }
 0x2f8   :  { %v2200_v9 = vpop.eup %2199  ;;  %v1092_v22 = vmul.f32 1.442695, %v1091_v18 }
 0x2f9   :  { %v577_v10 = vsel %vm163_vm2, %v2200_v9, 0.0  ;;  %v1257_v17 = vpop.xlane.xlu1 %1256 }
 0x2fa   :  { %578 = vadd.xlane.f32.xlu1 %v577_v10  ;;  %v1258_v20 = vsub.f32 %v1251_v47, %v1257_v17  ;;  %2205 = vpow2.f32 %v1092_v22  ;;  %v47_v10 = vld [vmem:[#allocation5 + $0x20] sm:$0xff] }
 0x2fc   :  { %v2495_v11 = vpop.eup %2201  ;;  %v1259_v23 = vmul.f32 1.442695, %v1258_v20 }
 0x2fd   :  { %v744_v12 = vsel %vm163_vm2, %v2495_v11, 0.0  ;;  %v1424_v21 = vpop.xlane.xlu0 %1423  ;;  %v752_v34 = vpop.permute.xlu1 %751 }
 0x2fe   :  { %745 = vadd.xlane.f32.xlu0 %v744_v12  ;;  %v1425_v24 = vsub.f32 %v1418_v50, %v1424_v21  ;;  %2207 = vpow2.f32 %v1259_v23 }
 0x300   :  { %v1426_v25 = vmul.f32 1.442695, %v1425_v24  ;;  %v2503_v26 = vpop.eup %2203 }
 0x301   :  { %v927_v28 = vsel %vm163_vm2, %v2503_v26, 0.0  ;;  %v585_v35 = vpop.permute.xlu0 %584 }
 0x302   :  { %2209 = vpow2.f32 %v1426_v25 }
 0x304   :  { %v2505_v27 = vpop.eup %2205 }
 0x305   :  { %v1094_v31 = vsel %vm163_vm2, %v2505_v27, 0.0 }
 0x308   :  { %v2509_v29 = vpop.eup %2207 }
 0x309   :  { %v1261_v30 = vsel %vm163_vm2, %v2509_v29, 0.0 }
 0x30b   :  { %1101 = vrot.lane.b32.xlu1 %v2424_v13, %s2344_s16 }
 0x30c   :  { %v2515_v32 = vpop.eup %2209 }
 0x30d   :  { %v1428_v33 = vsel %vm163_vm2, %v2515_v32, 0.0 }
 0x314   :  { %934 = vrot.lane.b32.xlu0 %v2424_v13, %s2345_s17 }
 0x32f   :  { %928 = vadd.xlane.f32.xlu1 %v927_v28 }
 0x333   :  { %1262 = vadd.xlane.f32.xlu1 %v1261_v30  ;;  %1095 = vadd.xlane.f32.xlu0 %v1094_v31 }
 0x337   :  { %1429 = vadd.xlane.f32.xlu1 %v1428_v33 }
 0x348   :  { %1435 = vrot.lane.b32.xlu1 %v2424_v13, %s2346_s18 }
 0x349   :  { %1268 = vrot.lane.b32.xlu0 %v2424_v13, %s2347_s19 }
 0x37f   :  { %v246_v36 = vpop.xlane.xlu1 %245 }
 0x380   :  { %2211 = vrcp.f32 %v246_v36  ;;  %v1929_v36 = vld [vmem:[#allocation5 + $0xa2] ss:$0 sm:$0xff] }
 0x383   :  { %v412_v37 = vpop.xlane.xlu0 %411 }
 0x384   :  { %2213 = vrcp.f32 %v412_v37 }
 0x387   :  { %v579_v38 = vpop.xlane.xlu1 %578 }
 0x388   :  { %2215 = vrcp.f32 %v579_v38 }
 0x38a   :  { %v2212_v39 = vpop.eup %2211 }
 0x38b   :  { %v248_v40 = vmul.f32 %v2212_v39, %v2196_v1  ;;  %v746_v41 = vpop.xlane.xlu0 %745  ;;  %v1102_v48 = vpop.permute.xlu1 %1101 }
 0x38c   :  { %2217 = vrcp.f32 %v746_v41 }
 0x38d   :  { %249 = vst.msk [vmem:[#allocation8] sm:$0xff] %vm163_vm2, %v248_v40  ;;  %2021 = vmatmul.mubr.msk.f32.vlgmr.msra.gmra.mrb[4].mxu1 %vm163_vm2, %v248_v40 }
 0x38e   :  { %v2214_v42 = vpop.eup %2213  ;;  %2029 = vmatpush3.msra.mxu1 %v2490_v53  ;;  %2030 = vmatprep.mubr.msk.f32.mxu1 %vm2336_vm1, %v2335_v8 }
 0x38f   :  { %v414_v13 = vmul.f32 %v2214_v42, %v2198_v4  ;;  %2038 = vmatprep.subr.mxu1 %v2335_v8  ;;  %v935_v47 = vpop.permute.xlu0 %934 }
 0x391   :  { %416 = vst.msk [vmem:[#allocation8 + $0x8] sm:$0xff] %vm163_vm2, %v414_v13  ;;  %2031 = vmatmul.mubr.msk.f32.vlgmr.msra.gmra.mrb[6].mxu1 %vm163_vm2, %v414_v13 }
 0x392   :  { %v2216_v43 = vpop.eup %2215  ;;  %2039 = vmatpush3.msra.mxu1 %v585_v35  ;;  %2040 = vmatprep.mubr.msk.f32.mxu1 %vm2336_vm1, %v2335_v8 }
 0x393   :  { %v581_v44 = vmul.f32 %v2216_v43, %v2200_v9  ;;  %2048 = vmatprep.subr.mxu1 %v2335_v8 }
 0x395   :  { %583 = vst.msk [vmem:[#allocation8 + $0x10] sm:$0xff] %vm163_vm2, %v581_v44  ;;  %2041 = vmatmul.mubr.msk.f32.vlgmr.msra.gmra.mrb[8].mxu1 %vm163_vm2, %v581_v44 }
 0x396   :  { %v2218_v45 = vpop.eup %2217  ;;  %2049 = vmatpush3.msra.mxu1 %v752_v34  ;;  %2050 = vmatprep.mubr.msk.f32.mxu1 %vm2336_vm1, %v2335_v8 }
 0x397   :  { %v748_v46 = vmul.f32 %v2218_v45, %v2495_v11  ;;  %2058 = vmatprep.subr.mxu1 %v2335_v8  ;;  %v48_v11 = vld [vmem:[#allocation5 + $0x28] sm:$0xff] }
 0x398   :  { %v2142_v12 = vpack.c.bf16 %v48_v11, %v47_v10 }
 0x399   :  { %750 = vst.msk [vmem:[#allocation8 + $0x18] sm:$0xff] %vm163_vm2, %v748_v46  ;;  %2051 = vmatmul.mubr.msk.f32.vlgmr.msra.gmra.mrb[10].mxu1 %vm163_vm2, %v748_v46 }
 0x39a   :  { %2059 = vmatpush3.msra.mxu1 %v935_v47  ;;  %2060 = vmatprep.mubr.msk.f32.mxu1 %vm2336_vm1, %v2335_v8 }
 0x39b   :  { %2068 = vmatprep.subr.mxu1 %v2335_v8  ;;  %2143 = vmatprep.subr.bf16.mxu0 %v2142_v12 }
 0x39c   :  { %2145 = vmatpush3.bf16.msra.mxu0 %v2142_v12 }
 0x3bc   :  { %v929_v49 = vpop.xlane.xlu1 %928 }
 0x3bd   :  { %2219 = vrcp.f32 %v929_v49 }
 0x3c0   :  { %v1263_v50 = vpop.xlane.xlu1 %1262  ;;  %v1096_v51 = vpop.xlane.xlu0 %1095 }
 0x3c1   :  { %2221 = vrcp.f32 %v1263_v50 }
 0x3c2   :  { %2223 = vrcp.f32 %v1096_v51 }
 0x3c4   :  { %v1430_v52 = vpop.xlane.xlu1 %1429  ;;  %v1269_v60 = vpop.permute.xlu0 %1268 }
 0x3c5   :  { %2225 = vrcp.f32 %v1430_v52 }
 0x3c7   :  { %v2220_v53 = vpop.eup %2219 }
 0x3c8   :  { %v931_v54 = vmul.f32 %v2220_v53, %v2503_v26  ;;  %v1436_v62 = vpop.permute.xlu1 %1435  ;;  %v52_v53 = vld [vmem:[#allocation5 + $0x48] sm:$0xff] }
 0x3ca   :  { %933 = vst.msk [vmem:[#allocation8 + $0x20] sm:$0xff] %vm163_vm2, %v931_v54  ;;  %2061 = vmatmul.mubr.msk.f32.vlgmr.msra.gmra.mrb[12].mxu1 %vm163_vm2, %v931_v54 }
 0x3cb   :  { %v2222_v55 = vpop.eup %2221  ;;  %2069 = vmatpush3.msra.mxu1 %v1102_v48  ;;  %2070 = vmatprep.mubr.msk.f32.mxu1 %vm2336_vm1, %v2335_v8 }
 0x3cc   :  { %v2224_v56 = vpop.eup %2223  ;;  %v1265_v57 = vmul.f32 %v2222_v55, %v2509_v29  ;;  %2078 = vmatprep.subr.mxu1 %v2335_v8  ;;  %v53_v55 = vld [vmem:[#allocation5 + $0x50] sm:$0xff] }
 0x3cd   :  { %v1098_v58 = vmul.f32 %v2224_v56, %v2505_v27  ;;  %v54_v56 = vld [vmem:[#allocation5 + $0x58] sm:$0xff] }
 0x3ce   :  { %1267 = vst.msk [vmem:[#allocation8 + $0x30] sm:$0xff] %vm163_vm2, %v1265_v57 }
 0x3cf   :  { %v2226_v59 = vpop.eup %2225  ;;  %1100 = vst.msk [vmem:[#allocation8 + $0x28] sm:$0xff] %vm163_vm2, %v1098_v58  ;;  %2071 = vmatmul.mubr.msk.f32.vlgmr.msra.gmra.mrb[14].mxu1 %vm163_vm2, %v1098_v58  ;;  %v55_v58 = vld [vmem:[#allocation5 + $0x60] sm:$0xff] }
 0x3d0   :  { %v1432_v61 = vmul.f32 %v2226_v59, %v2515_v32  ;;  %2079 = vmatpush3.msra.mxu1 %v1269_v60  ;;  %2080 = vmatprep.mubr.msk.f32.mxu1 %vm2336_vm1, %v2335_v8  ;;  %v56_v59 = vld [vmem:[#allocation5 + $0x68] sm:$0xff]  ;;  %v57_v60 = vld [vmem:[#allocation5 + $0x70] sm:$0xff] }
 0x3d1   :  { %2088 = vmatprep.subr.mxu1 %v2335_v8 }
 0x3d2   :  { %1434 = vst.msk [vmem:[#allocation8 + $0x38] sm:$0xff] %vm163_vm2, %v1432_v61 }
 0x3d3   :  { %2081 = vmatmul.mubr.msk.f32.vlgmr.msra.gmra.mrb[16].mxu1 %vm163_vm2, %v1265_v57  ;;  %v2154_v57 = vpack.c.bf16 %v54_v56, %v53_v55 }
 0x3d4   :  { %2089 = vmatpush3.msra.mxu1 %v1436_v62  ;;  %2090 = vmatprep.mubr.msk.f32.mxu1 %vm2336_vm1, %v2335_v8  ;;  %v49_v8 = vld [vmem:[#allocation5 + $0x30] sm:$0xff]  ;;  %v58_v62 = vld [vmem:[#allocation5 + $0x78] sm:$0xff] }
 0x3d5   :  { %v2146_v15 = vpack.c.bf16 %v50_v14, %v49_v8  ;;  %v1932_v8 = vld [vmem:[#allocation5 + $0xa3] ss:$0 sm:$0xff] }
 0x3d7   :  { %2091 = vmatmul.mubr.msk.f32.vlgmr.msra.gmra.mrb[18].mxu1 %vm163_vm2, %v1432_v61  ;;  %2147 = vmatprep.subr.bf16.mxu0 %v2146_v15  ;;  %v2158_v61 = vpack.c.bf16 %v56_v59, %v55_v58 }
 0x3d8   :  { %2149 = vmatpush3.bf16.msra.mxu0 %v2146_v15  ;;  %v1933_v15 = vld [vmem:[#allocation5 + $0xa4] ss:$0 sm:$0xff] }
 0x3d9   :  { %2159 = vmatprep.subr.bf16.mxu0 %v2158_v61 }
 0x460   :  { %v322_v63 = vpop.f32.mrb[4].mxu1 }
 0x461   :  { %v2022_v0 = vpop.f32.mrb[5].mxu1 }
 0x462   :  { %v59_v0 = vld [vmem:[#allocation5 + $0x80] sm:$0xff] }
 0x464   :  { %v489_v1 = vpop.f32.mrb[6].mxu1 }
 0x465   :  { %828 = vrot.lane.b32.xlu0 %v489_v1, %s2333_s23  ;;  %v2032_v2 = vpop.f32.mrb[7].mxu1  ;;  %v60_v1 = vld [vmem:[#allocation5 + $0x88] sm:$0xff] }
 0x466   :  { %v2166_v2 = vpack.c.bf16 %v60_v1, %v59_v0 }
 0x468   :  { %v656_v3 = vpop.f32.mrb[8].mxu1 }
 0x469   :  { %832 = vrot.lane.b32.xlu1 %v656_v3, %s2348_s20  ;;  %v2042_v4 = vpop.f32.mrb[9].mxu1 }
 0x46c   :  { %v823_v6 = vpop.f32.mrb[10].mxu1 }
 0x46d   :  { %836 = vrot.lane.b32.xlu1 %v823_v6, %s2349_s21  ;;  %v2052_v9 = vpop.f32.mrb[11].mxu1 }
 0x49d   :  { %v1006_v16 = vpop.f32.mrb[12].mxu1 }
 0x49e   :  { %v2062_v17 = vpop.f32.mrb[13].mxu1 }
 0x4a2   :  { %v1173_v18 = vpop.f32.mrb[14].mxu1 }
 0x4a3   :  { %1512 = vrot.lane.b32.xlu0 %v1173_v18, %s2333_s23  ;;  %v2072_v19 = vpop.f32.mrb[15].mxu1 }
 0x4a6   :  { %v1340_v20 = vpop.f32.mrb[16].mxu1 }
 0x4a7   :  { %1516 = vrot.lane.b32.xlu0 %v1340_v20, %s2348_s20  ;;  %v2082_v21 = vpop.f32.mrb[17].mxu1 }
 0x4aa   :  { %v1507_v22 = vpop.f32.mrb[18].mxu1 }
 0x4ab   :  { %1520 = vrot.lane.b32.xlu1 %v1507_v22, %s2349_s21  ;;  %v2092_v23 = vpop.f32.mrb[19].mxu1  ;;  %v61_v22 = vld [vmem:[#allocation5 + $0x90] sm:$0xff] }
 0x4ac   :  { %v62_v23 = vld [vmem:[#allocation5 + $0x98] sm:$0xff] }
 0x4d7   :  { %v829_v24 = vpop.permute.xlu0 %828 }
 0x4d8   :  { %v839_v26 = vsel %vm163_vm2, %v322_v63, %v829_v24  ;;  %v2162_v63 = vpack.c.bf16 %v58_v62, %v57_v60  ;;  %v2170_v24 = vpack.c.bf16 %v62_v23, %v61_v22 }
 0x4db   :  { %v833_v25 = vpop.permute.xlu1 %832 }
 0x4dc   :  { %v841_v27 = vsel %vm840_vm3, %v839_v26, %v833_v25  ;;  %v1934_v25 = vld [vmem:[#allocation5 + $0xa1] ss:$0 sm:$0xff] }
 0x4df   :  { %v837_v28 = vpop.permute.xlu1 %836 }
 0x4e0   :  { %v843_v29 = vsel %vm842_vm4, %v841_v27, %v837_v28 }
 0x4e1   :  { %2101 = vmatprep.mubr.msk.f32.mxu0 %vm78_vm0, %v843_v29 }
 0x515   :  { %v1513_v30 = vpop.permute.xlu0 %1512 }
 0x516   :  { %v1523_v32 = vsel %vm163_vm2, %v1006_v16, %v1513_v30 }
 0x519   :  { %v1517_v31 = vpop.permute.xlu0 %1516 }
 0x51a   :  { %v1524_v33 = vsel %vm840_vm3, %v1523_v32, %v1517_v31  ;;  %v1937_v32 = vld [vmem:[#allocation5 + $0xa5] ss:$0 sm:$0xff] }
 0x51d   :  { %v1521_v34 = vpop.permute.xlu1 %1520 }
 0x51e   :  { %v1525_v35 = vsel %vm842_vm4, %v1524_v33, %v1521_v34 }
 0x51f   :  { %2102 = vmatmul.mubr.msk.f32.vlgmr.msra.gmra.mrb[14].mxu0 %vm78_vm0, %v1525_v35 }
 0x520   :  { %2161 = vmatpush3.bf16.msra.mxu0 %v2158_v61 }
 0x521   :  { %2163 = vmatprep.subr.bf16.mxu0 %v2162_v63 }
 0x524   :  { %2165 = vmatpush3.bf16.msra.mxu0 %v2162_v63 }
 0x525   :  { %2167 = vmatprep.subr.bf16.mxu0 %v2166_v2 }
 0x528   :  { %2169 = vmatpush3.bf16.msra.mxu0 %v2166_v2 }
 0x529   :  { %2171 = vmatprep.subr.bf16.mxu0 %v2170_v24 }
 0x52c   :  { %2173 = vmatpush3.bf16.msra.mxu0 %v2170_v24 }
 0x5f2   :  { %v2103_v37 = vpop.f32.mrb[14].mxu0 }
 0x5f3   :  { %v1608_v38 = vadd.f32 %v2103_v37, %v1929_v36  ;;  %v1602_v39 = vpop.f32.mrb[15].mxu0 }
 0x5f4   :  { %v1603_v40 = vadd.f32 %v1929_v36, %v1602_v39 }
 0x5f5   :  { %v1612_v41 = vadd.f32 %v1608_v38, %v2406_v7 }
 0x5f6   :  { %v1611_v42 = vadd.f32 %v1603_v40, %v2402_v5  ;;  %v51_v5 = vld [vmem:[#allocation5 + $0x40] sm:$0xff] }
 0x5f7   :  { %v1616_v13 = vsel %vm78_vm0, %v1612_v41, 0.0  ;;  %v2150_v54 = vpack.c.bf16 %v52_v53, %v51_v5 }
 0x5f8   :  { %1617 = vadd.xlane.f32.xlu1 %v1616_v13  ;;  %v1613_v43 = vsel %vm78_vm0, %v1611_v42, 0.0 }
 0x5f9   :  { %1614 = vadd.xlane.f32.xlu0 %v1613_v43  ;;  %2151 = vmatprep.subr.bf16.mxu1 %v2150_v54 }
 0x5fa   :  { %2153 = vmatpush3.bf16.msra.mxu1 %v2150_v54 }
 0x5fb   :  { %2155 = vmatprep.subr.bf16.mxu1 %v2154_v57 }
 0x5fe   :  { %2157 = vmatpush3.bf16.msra.mxu1 %v2154_v57 }
 0x685   :  { %v1618_v44 = vpop.xlane.xlu1 %1617 }
 0x686   :  { %v1621_v45 = vmul.f32 0.03125, %v1618_v44  ;;  %v1615_v46 = vpop.xlane.xlu0 %1614 }
 0x687   :  { %v1620_v47 = vmul.f32 0.03125, %v1615_v46 }
 0x688   :  { %v1623_v48 = vsub.f32 %v1612_v41, %v1621_v45 }
 0x689   :  { %v1622_v49 = vsub.f32 %v1611_v42, %v1620_v47 }
 0x68a   :  { %v1625_v52 = vmul.f32 %v1623_v48, %v1623_v48 }
 0x68b   :  { %v1624_v50 = vmul.f32 %v1622_v49, %v1622_v49 }
 0x68c   :  { %v1629_v7 = vsel %vm78_vm0, %v1625_v52, 0.0 }
 0x68d   :  { %v1626_v51 = vsel %vm78_vm0, %v1624_v50, 0.0 }
 0x68e   :  { %1627 = vadd.xlane.f32.xlu0 %v1626_v51 }
 0x692   :  { %1630 = vadd.xlane.f32.xlu0 %v1629_v7 }
 0x71b   :  { %v1628_v3 = vpop.xlane.xlu0 %1627 }
 0x71c   :  { %v1632_v4 = vmul.f32 0.03125, %v1628_v3 }
 0x71e   :  { %v1634_v6 = vadd.f32 1e-05, %v1632_v4 }
 0x71f   :  { %v1631_v9 = vpop.xlane.xlu0 %1630 }
 0x720   :  { %2227 = vrsqrt.f32 %v1634_v6  ;;  %v1633_v10 = vmul.f32 0.03125, %v1631_v9 }
 0x722   :  { %v1635_v11 = vadd.f32 1e-05, %v1633_v10 }
 0x724   :  { %2229 = vrsqrt.f32 %v1635_v11 }
 0x72a   :  { %v2228_v12 = vpop.eup %2227 }
 0x72b   :  { %v1638_v14 = vmul.f32 %v2228_v12, %v1622_v49 }
 0x72d   :  { %v1644_v16 = vmul.f32 %v1932_v8, %v1638_v14 }
 0x72e   :  { %v2230_v17 = vpop.eup %2229 }
 0x72f   :  { %v1639_v18 = vmul.f32 %v2230_v17, %v1623_v48  ;;  %v1650_v19 = vadd.f32 %v1933_v15, %v1644_v16 }
 0x731   :  { %v1645_v20 = vmul.f32 %v1932_v8, %v1639_v18  ;;  %2112 = vmatprep.mubr.msk.f32.mxu1 %vm78_vm0, %v1650_v19 }
 0x733   :  { %v1651_v21 = vadd.f32 %v1933_v15, %v1645_v20 }
 0x735   :  { %2113 = vmatmul.mubr.msk.f32.vlgmr.msra.gmra.mrb[20].mxu1 %vm78_vm0, %v1651_v21 }
 0x808   :  { %v2114_v26 = vpop.f32.mrb[20].mxu1 }
 0x809   :  { %v1734_v27 = vadd.f32 %v2114_v26, %v1934_v25  ;;  %v1728_v28 = vpop.f32.mrb[21].mxu1 }
 0x80a   :  { %v1729_v29 = vadd.f32 %v1934_v25, %v1728_v28 }
 0x80b   :  { %v1738_v31 = vmax.f32 %v1734_v27, 0.0 }
 0x80c   :  { %v1737_v30 = vmax.f32 %v1729_v29, 0.0 }
 0x80e   :  { %2131 = vmatprep.mubr.msk.f32.mxu0 %vm1743_vm5, %v1737_v30 }
 0x80f   :  { %2132 = vmatmul.mubr.msk.f32.vlgmr.msra.gmra.mrb[16].mxu0 %vm1743_vm5, %v1738_v31 }
 0x8e2   :  { %v2133_v33 = vpop.f32.mrb[16].mxu0 }
 0x8e3   :  { %v1822_v34 = vadd.f32 %v2133_v33, %v1937_v32  ;;  %v1816_v35 = vpop.f32.mrb[17].mxu0 }
 0x8e4   :  { %v1817_v36 = vadd.f32 %v1937_v32, %v1816_v35 }
 0x8e5   :  { %v1826_v37 = vadd.f32 %v1822_v34, %v1651_v21 }
 0x8e6   :  { %v1825_v38 = vadd.f32 %v1817_v36, %v1650_v19 }
 0x8e7   :  { %v1830_v39 = vsel %vm78_vm0, %v1826_v37, 0.0 }
 0x8e8   :  { %1831 = vadd.xlane.f32.xlu0 %v1830_v39  ;;  %v1827_v40 = vsel %vm78_vm0, %v1825_v38, 0.0 }
 0x8e9   :  { %1828 = vadd.xlane.f32.xlu1 %v1827_v40 }
 0x975   :  { %v1832_v41 = vpop.xlane.xlu0 %1831 }
 0x976   :  { %v1834_v42 = vmul.f32 0.03125, %v1832_v41  ;;  %v1829_v13 = vpop.xlane.xlu1 %1828 }
 0x977   :  { %v1833_v43 = vmul.f32 0.03125, %v1829_v13 }
 0x978   :  { %v1836_v44 = vsub.f32 %v1826_v37, %v1834_v42 }
 0x979   :  { %v1835_v45 = vsub.f32 %v1825_v38, %v1833_v43 }
 0x97a   :  { %v1838_v46 = vmul.f32 %v1836_v44, %v1836_v44 }
 0x97b   :  { %v1837_v47 = vmul.f32 %v1835_v45, %v1835_v45 }
 0x97c   :  { %v1842_v48 = vsel %vm78_vm0, %v1838_v46, 0.0 }
 0x97d   :  { %1843 = vadd.xlane.f32.xlu0 %v1842_v48  ;;  %v1839_v49 = vsel %vm78_vm0, %v1837_v47, 0.0 }
 0x97e   :  { %1840 = vadd.xlane.f32.xlu1 %v1839_v49 }
 0x97f   :  { %2290 = shalt.err (!%p2287_p6)
}
 0x980   :  { %s2291_s29 = scalar_lea.hbm %s2618_s3, 1024 }
 0x981   :  { %p2292_p7 = scmp.ne.s32.totalorder %s2618_s3, %s2291_s29  ;;  %p2295_p8 = scmp.lt.u32.totalorder %s2291_s29, %s2618_s3 }
 0x983   :  { %p2297_p9 = pnand %p2295_p8, %p2292_p7 }
 0x985   :  { %2300 = shalt.err (!%p2297_p9)
}
 0x986   :  { %1891 = dma.vmem_to_hbm [thread:$0]  %s1886_s25, 1024, %s2618_s3, [#allocation9], %s2332_s22, %s2332_s22, %s2333_s23   ;;  %v1940_v55 = vld [vmem:[#allocation5 + $0xa6] ss:$0 sm:$0xff]  ;;  %v1941_v59 = vld [vmem:[#allocation5 + $0xa7] ss:$0 sm:$0xff] }
 0x987   :  { %s2351_s0 = smov [#allocation7]  }
 0x988   :  { %s1873_s9 = sshll.u32 %s2351_s0, 4  ;;  %s1874_s9 = int_to_ptr.vmem [resolvable:$true] %s1873_s9 }
 0x989   :  { %s2301_s3 = scalar_lea.vmem %s1874_s9, 256  ;;  %p2306_p11 = scmp.lt.s32.totalorder %s1874_s9, %s1874_s9 }
 0x98a   :  { %p2302_p10 = scmp.ne.s32.totalorder %s1874_s9, %s2301_s3  ;;  %p2307_p12 = scmp.lt.s32.totalorder %s2301_s3, %s2301_s3 }
 0x98c   :  { %p2308_p13 = por %p2307_p12, %p2306_p11 }
 0x98e   :  { %p2309_p0 = pnand %p2308_p13, %p2302_p10 }
 0xa0a   :  { %v1844_v50 = vpop.xlane.xlu0 %1843 }
 0xa0b   :  { %v1846_v51 = vmul.f32 0.03125, %v1844_v50  ;;  %v1841_v52 = vpop.xlane.xlu1 %1840 }
 0xa0c   :  { %v1845_v7 = vmul.f32 0.03125, %v1841_v52 }
 0xa0d   :  { %v1848_v5 = vadd.f32 1e-05, %v1846_v51 }
 0xa0e   :  { %v1847_v53 = vadd.f32 1e-05, %v1845_v7 }
 0xa0f   :  { %2231 = vrsqrt.f32 %v1848_v5 }
 0xa10   :  { %2233 = vrsqrt.f32 %v1847_v53 }
 0xa19   :  { %v2232_v54 = vpop.eup %2231 }
 0xa1a   :  { %v2234_v56 = vpop.eup %2233  ;;  %v1852_v57 = vmul.f32 %v2232_v54, %v1836_v44 }
 0xa1b   :  { %v1851_v58 = vmul.f32 %v2234_v56, %v1835_v45 }
 0xa1c   :  { %v1858_v60 = vmul.f32 %v1940_v55, %v1852_v57 }
 0xa1d   :  { %v1857_v61 = vmul.f32 %v1940_v55, %v1851_v58 }
 0xa1e   :  { %v1864_v62 = vadd.f32 %v1941_v59, %v1858_v60 }
 0xa1f   :  { %v1863_v63 = vadd.f32 %v1941_v59, %v1857_v61 }
 0xa20   :  { %1867 = vst.msk [vmem:[#allocation7 + $0x8] sm:$0xff] %vm78_vm0, %v1864_v62 }
 0xa21   :  { %1865 = vst.msk [vmem:[#allocation7] sm:$0xff] %vm78_vm0, %v1863_v63 }
 0xa22   :  { %2312 = shalt.err (!%p2309_p0)
}
 0xa23   :  { %s2313_s11 = scalar_lea.hbm %s2617_s2, 256 }
 0xa24   :  { %p2314_p1 = scmp.ne.s32.totalorder %s2617_s2, %s2313_s11  ;;  %p2317_p2 = scmp.lt.u32.totalorder %s2313_s11, %s2617_s2 }
 0xa26   :  { %p2319_p3 = pnand %p2317_p2, %p2314_p1 }
 0xa28   :  { %2322 = shalt.err (!%p2319_p3)
}
 0xa29   :  { %1879 = dma.vmem_to_hbm [thread:$0]  %s1874_s9, 256, %s2617_s2, [#allocation4], %s2332_s22, %s2332_s22, %s2333_s23  }
 0xa2a   :  { %2327 = dma.done.wait [#allocation4], 256  }
 0xa2b   :  { %2328 = vsyncadd [#allocation4], 4294967040 }
 0xa2c   :  { %2329 = dma.done.wait [#allocation9], 1024  }
 0xa2d   :  { %2330 = vsyncadd [#allocation9], 4294966272 }
 0xa2e   :  { %1898 = vsyncpa [#allocation3], 1 }
 0xa2f   :  { %1899 = vsyncpa [#allocation6], 1 }
 0xa30   :  { %1900 = vsyncpa [#allocation4], 1 }
 0xa31   :  { %1901 = vsyncpa [#allocation9], 1 }

</bundles_post_ra>
